<compile_context>
chip_gen: v7x
topology: tpu7x:2x2x1
jax: 0.10.0
libtpu: 0.0.40
codegen_flags: <defaults>
</compile_context>

<pallas_src>
import functools

import jax
import jax.numpy as jnp
from jax import lax
from jax.experimental import pallas as pl
from jax.experimental.pallas import tpu as pltpu


def _round_up(x, m):
    return ((x + m - 1) // m) * m


# -----------------------------------------------------------------------------
# Kernel 1: fused per-image forward
#   jaccard IoU + per-prior max/argmax + cross-tile best-prior-per-GT accumulator,
#   class softmax (bf16 store), box decoding — all lane-dense.
# -----------------------------------------------------------------------------
def _fused_forward_kernel(truths_ref, priors_pt_ref, conf_ref, loc_ref, priors_ref,
                          bto_ref, bti_ref, bpi_ref, probs_ref, dec_ref,
                          bpv_ref, *, var0, var1):
    t_idx = pl.program_id(1)                             # P-tile index (arbitrary axis)

    # ---- pairwise jaccard IoU: GT rows on sublanes, priors on lanes ----
    tb = truths_ref[0]                                   # (O, 4) point form
    O = tb.shape[0]
    txmin, tymin = tb[:, 0:1], tb[:, 1:2]                # (O, 1)
    txmax, tymax = tb[:, 2:3], tb[:, 3:4]
    pxmin = priors_pt_ref[0:1, :]                        # (1, TP)
    pymin = priors_pt_ref[1:2, :]
    pxmax = priors_pt_ref[2:3, :]
    pymax = priors_pt_ref[3:4, :]
    iw = jnp.maximum(jnp.minimum(txmax, pxmax) - jnp.maximum(txmin, pxmin), 0.0)
    ih = jnp.maximum(jnp.minimum(tymax, pymax) - jnp.maximum(tymin, pymin), 0.0)
    inter = iw * ih                                      # (O, TP)
    area_t = (txmax - txmin) * (tymax - tymin)           # (O, 1)
    area_p = (pxmax - pxmin) * (pymax - pymin)           # (1, TP)
    ov = inter / jnp.maximum(area_t + area_p - inter, 1e-12)   # exact div (mem-bound)

    TP = ov.shape[1]
    # best GT per prior: max / argmax over the O sublane axis -> (1, TP)
    best_t = jnp.max(ov, axis=0, keepdims=True)
    iota_o = lax.broadcasted_iota(jnp.int32, ov.shape, 0)
    bti_ref[0] = jnp.min(jnp.where(ov == best_t, iota_o, O), axis=0, keepdims=True)
    bto_ref[0] = best_t

    # best prior per GT: running (max, argmax) accumulated across the tile axis
    maxv = jnp.max(ov, axis=1, keepdims=True)            # (O, 1)
    iota_p = lax.broadcasted_iota(jnp.int32, ov.shape, 1)
    local_arg = jnp.min(jnp.where(ov == maxv, iota_p, TP), axis=1, keepdims=True)
    gidx = local_arg + t_idx * TP                        # global prior index

    @pl.when(t_idx == 0)
    def _():
        bpv_ref[...] = jnp.full_like(bpv_ref, -1.0)      # IoU >= 0, so tile 0 always wins

    better = maxv > bpv_ref[...]                         # strict > keeps first occurrence
    bpi_ref[0] = jnp.where(better, gidx, bpi_ref[0])
    bpv_ref[...] = jnp.where(better, maxv, bpv_ref[...])

    # ---- softmax over classes (class axis on sublanes: (C, TP)); bf16 store ----
    x = conf_ref[0]                                      # (C, TP)
    m = jnp.max(x, axis=0, keepdims=True)
    e = jnp.exp(x - m)
    s = jnp.sum(e, axis=0, keepdims=True)
    probs_ref[0] = (e / s).astype(jnp.bfloat16)          # NMS-only consumer -> bf16 is enough

    # ---- decode loc offsets -> point-form boxes ((4, TP), sliced sublane stores) ----
    lc = loc_ref[0]                                      # (4, TP)
    pr = priors_ref[...]                                 # (4, TP) center form
    cx = pr[0:1] + lc[0:1] * var0 * pr[2:3]
    cy = pr[1:2] + lc[1:2] * var0 * pr[3:4]
    w = pr[2:3] * jnp.exp(lc[2:3] * var1)
    h = pr[3:4] * jnp.exp(lc[3:4] * var1)
    dec_ref[0, 0:1, :] = cx - 0.5 * w
    dec_ref[0, 1:2, :] = cy - 0.5 * h
    dec_ref[0, 2:3, :] = cx + 0.5 * w
    dec_ref[0, 3:4, :] = cy + 0.5 * h


def fused_forward_pallas(truths, priors_pt_t, conf_cp, loc_cp, priors_t,
                         var0, var1, tile_p):
    B, O, _ = truths.shape
    _, C, P = conf_cp.shape
    nt = P // tile_p
    kernel = functools.partial(_fused_forward_kernel, var0=var0, var1=var1)
    bt3 = lambda b, t: (b, 0, t)
    return pl.pallas_call(
        kernel,
        out_shape=(jax.ShapeDtypeStruct((B, 1, P), jnp.float32),    # best_truth_overlap
                   jax.ShapeDtypeStruct((B, 1, P), jnp.int32),      # best_truth_idx
                   jax.ShapeDtypeStruct((B, O, 1), jnp.int32),      # best_prior_idx
                   jax.ShapeDtypeStruct((B, C, P), jnp.bfloat16),   # softmax probs (NMS only)
                   jax.ShapeDtypeStruct((B, 4, P), jnp.float32)),   # decoded boxes
        grid_spec=pltpu.PrefetchScalarGridSpec(
            num_scalar_prefetch=0,
            grid=(B, nt),
            in_specs=[pl.BlockSpec((1, O, 4), lambda b, t: (b, 0, 0)),
                      pl.BlockSpec((4, tile_p), lambda b, t: (0, t)),
                      pl.BlockSpec((1, C, tile_p), bt3),
                      pl.BlockSpec((1, 4, tile_p), bt3),
                      pl.BlockSpec((4, tile_p), lambda b, t: (0, t))],
            out_specs=(pl.BlockSpec((1, 1, tile_p), bt3),
                       pl.BlockSpec((1, 1, tile_p), bt3),
                       pl.BlockSpec((1, O, 1), lambda b, t: (b, 0, 0)),  # resident across t
                       pl.BlockSpec((1, C, tile_p), bt3),
                       pl.BlockSpec((1, 4, tile_p), bt3)),
            scratch_shapes=[pltpu.VMEM((O, 1), jnp.float32)]),      # running best-prior IoU
        compiler_params=pltpu.CompilerParams(
            dimension_semantics=("parallel", "arbitrary")),
    )(truths, priors_pt_t, conf_cp, loc_cp, priors_t)


# -----------------------------------------------------------------------------
# Kernel 2: masked cross-entropy + smooth-L1 (encode folded in), lane-dense.
#   conf_p is recomputed here in f32 from raw logits (exact math on the loss path);
#   per-prior partials are accumulated across P-tiles into a resident (1,3,TILE_P) block.
# -----------------------------------------------------------------------------
def _loss_kernel(conf_ref, loc_ref, aux_ref, priors_ref, out_ref,
                 *, var0, var1, conf_thresh):
    t_idx = pl.program_id(1)

    x = conf_ref[0]                                      # (C, TP) raw f32 logits
    m = jnp.max(x, axis=0, keepdims=True)
    e = jnp.exp(x - m)
    s = jnp.sum(e, axis=0, keepdims=True)
    probs = e / s                                        # exact division on the loss path
    cls = lax.broadcasted_iota(jnp.int32, probs.shape, 0)
    # conf_p: thresholded probs with the background class (index 0, reference semantics) zeroed
    cp = jnp.where((probs > conf_thresh) & (cls > 0), probs, 0.0)

    # effective priors: any non-background class prob exceeded conf_thresh
    eff = (jnp.sum(cp, axis=0, keepdims=True) != 0.0).astype(jnp.float32)   # (1, TP)

    # cross-entropy: F.cross_entropy treats conf_p rows as logits (reference semantics)
    m2 = jnp.max(cp, axis=0, keepdims=True)
    lse = jnp.log(jnp.sum(jnp.exp(cp - m2), axis=0, keepdims=True)) + m2    # (1, TP)
    ct = aux_ref[0, 0:1, :].astype(jnp.int32)            # matched class id (exact small ints)
    picked = jnp.sum(jnp.where(cls == ct, cp, 0.0), axis=0, keepdims=True)
    ce_per = (lse - picked) * eff

    kp = aux_ref[0, 1:2, :]                              # (1, TP) NMS keep mask
    mt = aux_ref[0, 2:6, :]                              # (4, TP) matched GT, point form
    pr = priors_ref[...]                                 # (4, TP) priors, center form
    lc = loc_ref[0]                                      # (4, TP) raw loc predictions

    # encode(matched, priors, variance); clamp widths so log() never produces -inf on
    # degenerate matches (inf * eff(=0) would be NaN). Exact division throughout.
    g_cx = ((mt[0:1] + mt[2:3]) * 0.5 - pr[0:1]) / (pr[2:3] * var0)
    g_cy = ((mt[1:2] + mt[3:4]) * 0.5 - pr[1:2]) / (pr[3:4] * var0)
    g_w = jnp.log(jnp.maximum(mt[2:3] - mt[0:1], 1e-6) / pr[2:3]) / var1
    g_h = jnp.log(jnp.maximum(mt[3:4] - mt[1:2], 1e-6) / pr[3:4]) / var1

    lp = lc * kp                                         # NMS-selected loc preds (else 0)

    def smooth_l1(d):
        ad = jnp.abs(d)
        return jnp.where(ad < 1.0, 0.5 * d * d, ad - 0.5)

    l1_per = (smooth_l1(lp[0:1] - g_cx) + smooth_l1(lp[1:2] - g_cy) +
              smooth_l1(lp[2:3] - g_w) + smooth_l1(lp[3:4] - g_h)) * eff    # (1, TP)

    # accumulate lane-dense partials across the P-tile axis into the resident out block
    @pl.when(t_idx == 0)
    def _():
        out_ref[...] = jnp.zeros_like(out_ref)

    out_ref[0, 0:1, :] += l1_per
    out_ref[0, 1:2, :] += ce_per
    out_ref[0, 2:3, :] += eff


def loss_pallas(conf_cp, loc_cp, aux, priors_t, var0, var1, conf_thresh, tile_p):
    B, C, P = conf_cp.shape
    nt = P // tile_p
    kernel = functools.partial(_loss_kernel, var0=var0, var1=var1,
                               conf_thresh=conf_thresh)
    bt3 = lambda b, t: (b, 0, t)
    return pl.pallas_call(
        kernel,
        out_shape=jax.ShapeDtypeStruct((B, 3, tile_p), jnp.float32),
        grid_spec=pltpu.PrefetchScalarGridSpec(
            num_scalar_prefetch=0,
            grid=(B, nt),
            in_specs=[pl.BlockSpec((1, C, tile_p), bt3),
                      pl.BlockSpec((1, 4, tile_p), bt3),
                      pl.BlockSpec((1, 6, tile_p), bt3),
                      pl.BlockSpec((4, tile_p), lambda b, t: (0, t))],
            out_specs=pl.BlockSpec((1, 3, tile_p), lambda b, t: (b, 0, 0))),  # resident over t
        compiler_params=pltpu.CompilerParams(
            dimension_semantics=("parallel", "arbitrary")),
    )(conf_cp, loc_cp, aux, priors_t)


# -----------------------------------------------------------------------------
# Plain-JAX glue: greedy per-class NMS over gathered top_k candidates
# -----------------------------------------------------------------------------
def _greedy_nms_keep(boxes_t, scores, cand, iou_thresh, top_k):
    """Greedy NMS (ssd.pytorch semantics) over the top_k candidates of one class.
    boxes_t is (4, P) point form. Returns a keep mask over all priors."""
    P = scores.shape[0]
    scores = scores.astype(jnp.float32)
    neg_inf = jnp.float32(-jnp.inf)
    masked = jnp.where(cand, scores, neg_inf)
    top_vals, top_idx = lax.top_k(masked, top_k)         # exactly top_k (matches reference cut)
    x1 = boxes_t[0][top_idx]
    y1 = boxes_t[1][top_idx]
    x2 = boxes_t[2][top_idx]
    y2 = boxes_t[3][top_idx]
    areas = (x2 - x1) * (y2 - y1)
    k_range = jnp.arange(top_k)
    active0 = top_vals > neg_inf                         # real candidates only
    keep0 = jnp.zeros((top_k,), dtype=bool)

    def body(_, state):
        keep, active = state
        sc = jnp.where(active, top_vals, neg_inf)
        i = jnp.argmax(sc)
        pick = active[i]
        keep = keep | (pick & (k_range == i))
        ix1 = jnp.maximum(x1, x1[i])
        iy1 = jnp.maximum(y1, y1[i])
        ix2 = jnp.minimum(x2, x2[i])
        iy2 = jnp.minimum(y2, y2[i])
        inter = jnp.maximum(ix2 - ix1, 0.0) * jnp.maximum(iy2 - iy1, 0.0)
        iou = inter / jnp.maximum(areas + areas[i] - inter, 1e-12)
        active = active & (iou <= iou_thresh) & (k_range != i)
        return keep, active

    keep_k, _ = lax.fori_loop(0, top_k, body, (keep0, active0))
    return jnp.zeros((P,), dtype=bool).at[top_idx].set(keep_k)


class PrecisionLossPallas:
    """JAX/Pallas re-implementation of PrecisionLoss.forward."""

    def __init__(self, num_classes, overlap_thresh, prior_for_matching, bkg_label,
                 top_k, encode_target, nms_thresh, conf_thresh, use_gpu=False):
        if nms_thresh <= 0:
            raise ValueError('nms_threshold must be non negative.')
        self.num_classes = num_classes
        self.threshold = overlap_thresh
        self.background_label = bkg_label   # reference forward hard-codes class 0 as background
        self.encode_target = encode_target
        self.use_prior_for_matching = prior_for_matching
        self.variance = (0.1, 0.2)          # cfg['variance'] (standard SSD config)
        self.top_k = top_k
        self.nms_thresh = nms_thresh
        self.conf_thresh = conf_thresh
        self._forward = jax.jit(self._forward_impl)

    def __call__(self, predictions, targets):
        loc_data, conf_data, priors = predictions
        return self._forward(loc_data, conf_data, priors, targets)

    def _forward_impl(self, loc_data, conf_data, priors, targets):
        B, P_in, _ = loc_data.shape
        C = self.num_classes
        var0, var1 = self.variance
        priors = priors[:P_in, :].astype(jnp.float32)
        loc_data = loc_data.astype(jnp.float32)
        conf_data = conf_data.astype(jnp.float32)

        # ---- pad the priors axis to a multiple of TILE_P (lane-dense stores, bounded
        #      per-step VMEM footprint on all generations, pipeline depth > B) ----
        tile_p = min(1024, _round_up(P_in, 128))
        P = _round_up(P_in, tile_p)
        pad = P - P_in
        if pad > 0:
            # degenerate priors far outside [0,1]^2 (zero IoU), unit size (finite encode)
            pad_prior = jnp.array([[-10.0, -10.0, 1.0, 1.0]], dtype=jnp.float32)
            priors = jnp.concatenate([priors, jnp.tile(pad_prior, (pad, 1))], axis=0)
            loc_data = jnp.pad(loc_data, ((0, 0), (0, pad), (0, 0)))
            # padded logits: background dominates -> below conf_thresh, never effective
            pad_logit = jnp.full((C,), -30.0, jnp.float32).at[0].set(0.0)
            conf_data = jnp.concatenate(
                [conf_data, jnp.broadcast_to(pad_logit, (B, pad, C))], axis=1)

        truths = targets[:, :, :4].astype(jnp.float32)              # (B, O, 4)
        labels = targets[:, :, 4].astype(jnp.int32)                 # (B, O)

        # lane-dense layouts: priors axis P on lanes, coords/classes on sublanes
        priors_t = priors.T                                         # (4, P) center form
        priors_pt = jnp.concatenate([priors[:, :2] - priors[:, 2:] * 0.5,
                                     priors[:, :2] + priors[:, 2:] * 0.5], axis=1)
        priors_pt_t = priors_pt.T                                   # (4, P) point form
        # TODO(synk): this transpose is one extra HBM pass over the largest tensor; the clean
        # fix is for the detection head to emit channels-first (B, C, P) conf directly.
        conf_cp = jnp.transpose(conf_data, (0, 2, 1))               # (B, C, P)
        loc_cp = jnp.transpose(loc_data, (0, 2, 1))                 # (B, 4, P)

        # ---- fused Pallas kernel: IoU + reductions, softmax (bf16), decode ----
        bto, bti, bpi, probs, decoded = fused_forward_pallas(
            truths, priors_pt_t, conf_cp, loc_cp, priors_t, var0, var1, tile_p)
        bto = bto[:, 0, :]                                          # (B, P)
        bti = bti[:, 0, :]                                          # (B, P)
        bpi = bpi[:, :, 0]                                          # (B, O)

        # ---- match() bookkeeping (tiny scatters/gathers, plain JAX) ----
        def _match_one(bto_i, bti_i, bpi_i, tr, lb):
            bto_i = bto_i.at[bpi_i].set(2.0)
            bti_i = bti_i.at[bpi_i].set(jnp.arange(tr.shape[0]))
            matches = tr[bti_i]                                     # (P, 4)
            conf = lb[bti_i] + 1
            conf = jnp.where(bto_i < self.threshold, 0, conf)
            return matches, conf

        matched, conf_t = jax.vmap(_match_one)(bto, bti, bpi, truths, labels)

        # ---- per-class thresholding + greedy NMS over gathered top_k candidates ----
        # TODO(synk): greedy NMS is an inherently sequential, data-dependent loop
        # (per-step argmax + dynamic gather of the picked box); kept in plain JAX.
        top_k = min(self.top_k, P)
        cand = probs > self.conf_thresh                             # (B, C, P)

        def _nms_one_image(boxes_t, probs_i, cand_i):
            def _per_class(sc, cm):
                return _greedy_nms_keep(boxes_t, sc, cm, self.nms_thresh, top_k)
            keeps = jax.vmap(_per_class)(probs_i[1:], cand_i[1:])   # (C-1, P)
            return jnp.any(keeps, axis=0)                           # (P,)

        loc_keep = jax.vmap(_nms_one_image)(decoded, probs, cand)   # (B, P)

        # pack the small per-prior loss-kernel inputs into one tensor (fewer DMAs/tiles)
        matched_t = jnp.transpose(matched, (0, 2, 1))               # (B, 4, P)
        aux = jnp.concatenate([conf_t[:, None, :].astype(jnp.float32),
                               loc_keep[:, None, :].astype(jnp.float32),
                               matched_t], axis=1)                  # (B, 6, P)

        # ---- masked cross-entropy + smooth-L1 (Pallas, encode folded in) ----
        parts = loss_pallas(conf_cp, loc_cp, aux, priors_t, var0, var1,
                            self.conf_thresh, tile_p)               # (B, 3, TILE_P)
        sums = jnp.sum(parts, axis=(0, 2))                          # [l_sum, c_sum, n_eff]
        N = jnp.maximum(sums[2] * C, 1.0)                           # guard N == 0
        loss_l = sums[0] / N
        loss_c = sums[1] / N
        return loss_l, loss_c


# -----------------------------------------------------------------------------
# Example run
# -----------------------------------------------------------------------------
if __name__ == "__main__":
    B, P, C, O = 2, 128, 8, 4

    key = jax.random.PRNGKey(0)
    k1, k2, k3, k4, k5, k6, k7 = jax.random.split(key, 7)

    loc_data = 0.5 * jax.random.normal(k1, (B, P, 4), dtype=jnp.float32)
    conf_data = jax.random.normal(k2, (B, P, C), dtype=jnp.float32)

    # priors: center-form boxes in [0,1]
    prior_cxcy = jax.random.uniform(k3, (P, 2), minval=0.2, maxval=0.8)
    prior_wh = jax.random.uniform(k4, (P, 2), minval=0.1, maxval=0.3)
    priors = jnp.concatenate([prior_cxcy, prior_wh], axis=1).astype(jnp.float32)

    # targets: (B, O, 5) point-form GT boxes + label
    gt_c = jax.random.uniform(k5, (B, O, 2), minval=0.25, maxval=0.75)
    gt_wh = jax.random.uniform(k6, (B, O, 2), minval=0.1, maxval=0.3)
    gt_boxes = jnp.concatenate([gt_c - gt_wh * 0.5, gt_c + gt_wh * 0.5], axis=2)
    gt_labels = jax.random.randint(k7, (B, O, 1), 0, C - 1).astype(jnp.float32)
    targets = jnp.concatenate([gt_boxes, gt_labels], axis=2).astype(jnp.float32)

    criterion = PrecisionLossPallas(num_classes=C, overlap_thresh=0.5,
                                    prior_for_matching=True, bkg_label=0,
                                    top_k=20, encode_target=False,
                                    nms_thresh=0.45, conf_thresh=0.1)

    loss_l, loss_c = criterion((loc_data, conf_data, priors), targets)
    jax.block_until_ready((loss_l, loss_c))
    assert bool(jnp.isfinite(loss_l)) and bool(jnp.isfinite(loss_c))
    print("KERNEL_OK")
</pallas_src>

<mosaic_0001>
module attributes {stable_mosaic.version = 11 : i64} {
  func.func @_fused_forward_kernel(%arg0: i32, %arg1: i32, %arg2: memref<1x4x4xf32, #tpu.memory_space<vmem>>, %arg3: memref<4x128xf32, #tpu.memory_space<vmem>>, %arg4: memref<1x8x128xf32, #tpu.memory_space<vmem>>, %arg5: memref<1x4x128xf32, #tpu.memory_space<vmem>>, %arg6: memref<4x128xf32, #tpu.memory_space<vmem>>, %arg7: memref<1x1x128xf32, #tpu.memory_space<vmem>>, %arg8: memref<1x1x128xi32, #tpu.memory_space<vmem>>, %arg9: memref<1x4x1xi32, #tpu.memory_space<vmem>>, %arg10: memref<1x8x128xbf16, #tpu.memory_space<vmem>>, %arg11: memref<1x4x128xf32, #tpu.memory_space<vmem>>, %arg12: memref<4x1xf32, #tpu.memory_space<vmem>>) attributes {dimension_semantics = [#tpu.dimension_semantics<parallel>, #tpu.dimension_semantics<arbitrary>], iteration_bounds = array<i64: 2, 1>, scalar_prefetch = 0 : i64, scratch_operands = 1 : i64, tpu.core_type = #tpu.core_type<tc>, window_params = [{transform_indices = @transform_0, window_bounds = array<i64: 1, 4, 4>}, {transform_indices = @transform_1, window_bounds = array<i64: 4, 128>}, {transform_indices = @transform_2, window_bounds = array<i64: 1, 8, 128>}, {transform_indices = @transform_3, window_bounds = array<i64: 1, 4, 128>}, {transform_indices = @transform_4, window_bounds = array<i64: 4, 128>}, {transform_indices = @transform_5, window_bounds = array<i64: 1, 1, 128>}, {transform_indices = @transform_6, window_bounds = array<i64: 1, 1, 128>}, {transform_indices = @transform_7, window_bounds = array<i64: 1, 4, 1>}, {transform_indices = @transform_8, window_bounds = array<i64: 1, 8, 128>}, {transform_indices = @transform_9, window_bounds = array<i64: 1, 4, 128>}]} {
    %c0 = arith.constant 0 : index
    %c0_0 = arith.constant 0 : index
    %c0_1 = arith.constant 0 : index
    %0 = vector.load %arg2[%c0, %c0_0, %c0_1] : memref<1x4x4xf32, #tpu.memory_space<vmem>>, vector<1x4x4xf32>
    %1 = vector.shape_cast %0 : vector<1x4x4xf32> to vector<4x4xf32>
    %2 = vector.extract_strided_slice %1 {offsets = [0, 0], sizes = [4, 1], strides = [1, 1]} : vector<4x4xf32> to vector<4x1xf32>
    %3 = vector.extract_strided_slice %1 {offsets = [0, 1], sizes = [4, 1], strides = [1, 1]} : vector<4x4xf32> to vector<4x1xf32>
    %4 = vector.extract_strided_slice %1 {offsets = [0, 2], sizes = [4, 1], strides = [1, 1]} : vector<4x4xf32> to vector<4x1xf32>
    %5 = vector.extract_strided_slice %1 {offsets = [0, 3], sizes = [4, 1], strides = [1, 1]} : vector<4x4xf32> to vector<4x1xf32>
    %c0_2 = arith.constant 0 : index
    %c0_3 = arith.constant 0 : index
    %6 = vector.load %arg3[%c0_2, %c0_3] : memref<4x128xf32, #tpu.memory_space<vmem>>, vector<1x128xf32>
    %c1 = arith.constant 1 : index
    %c0_4 = arith.constant 0 : index
    %7 = vector.load %arg3[%c1, %c0_4] : memref<4x128xf32, #tpu.memory_space<vmem>>, vector<1x128xf32>
    %c2 = arith.constant 2 : index
    %c0_5 = arith.constant 0 : index
    %8 = vector.load %arg3[%c2, %c0_5] : memref<4x128xf32, #tpu.memory_space<vmem>>, vector<1x128xf32>
    %c3 = arith.constant 3 : index
    %c0_6 = arith.constant 0 : index
    %9 = vector.load %arg3[%c3, %c0_6] : memref<4x128xf32, #tpu.memory_space<vmem>>, vector<1x128xf32>
    %10 = vector.broadcast %4 : vector<4x1xf32> to vector<4x128xf32>
    %11 = vector.broadcast %8 : vector<1x128xf32> to vector<4x128xf32>
    %12 = arith.minimumf %10, %11 : vector<4x128xf32>
    %13 = vector.broadcast %2 : vector<4x1xf32> to vector<4x128xf32>
    %14 = vector.broadcast %6 : vector<1x128xf32> to vector<4x128xf32>
    %15 = arith.maximumf %13, %14 : vector<4x128xf32>
    %16 = arith.subf %12, %15 : vector<4x128xf32>
    %cst = arith.constant 0.000000e+00 : f32
    %17 = vector.broadcast %cst : f32 to vector<4x128xf32>
    %18 = arith.maximumf %16, %17 : vector<4x128xf32>
    %19 = vector.broadcast %5 : vector<4x1xf32> to vector<4x128xf32>
    %20 = vector.broadcast %9 : vector<1x128xf32> to vector<4x128xf32>
    %21 = arith.minimumf %19, %20 : vector<4x128xf32>
    %22 = vector.broadcast %3 : vector<4x1xf32> to vector<4x128xf32>
    %23 = vector.broadcast %7 : vector<1x128xf32> to vector<4x128xf32>
    %24 = arith.maximumf %22, %23 : vector<4x128xf32>
    %25 = arith.subf %21, %24 : vector<4x128xf32>
    %cst_7 = arith.constant 0.000000e+00 : f32
    %26 = vector.broadcast %cst_7 : f32 to vector<4x128xf32>
    %27 = arith.maximumf %25, %26 : vector<4x128xf32>
    %28 = arith.mulf %18, %27 : vector<4x128xf32>
    %29 = arith.subf %4, %2 : vector<4x1xf32>
    %30 = arith.subf %5, %3 : vector<4x1xf32>
    %31 = arith.mulf %29, %30 : vector<4x1xf32>
    %32 = arith.subf %8, %6 : vector<1x128xf32>
    %33 = arith.subf %9, %7 : vector<1x128xf32>
    %34 = arith.mulf %32, %33 : vector<1x128xf32>
    %35 = vector.broadcast %31 : vector<4x1xf32> to vector<4x128xf32>
    %36 = vector.broadcast %34 : vector<1x128xf32> to vector<4x128xf32>
    %37 = arith.addf %35, %36 : vector<4x128xf32>
    %38 = arith.subf %37, %28 : vector<4x128xf32>
    %cst_8 = arith.constant 9.99999996E-13 : f32
    %39 = vector.broadcast %cst_8 : f32 to vector<4x128xf32>
    %40 = arith.maximumf %38, %39 : vector<4x128xf32>
    %41 = arith.divf %28, %40 : vector<4x128xf32>
    %cst_9 = arith.constant dense<0xFF800000> : vector<128xf32>
    %42 = vector.multi_reduction <maximumf>, %41, %cst_9 [0] : vector<4x128xf32> to vector<128xf32>
    %43 = vector.shape_cast %42 : vector<128xf32> to vector<1x128xf32>
    %44 = tpu.iota {dimensions = array<i32: 0>} : vector<4x128xi32>
    %45 = vector.broadcast %43 : vector<1x128xf32> to vector<4x128xf32>
    %46 = arith.cmpf oeq, %41, %45 : vector<4x128xf32>
    %c4_i32 = arith.constant 4 : i32
    %47 = vector.broadcast %c4_i32 : i32 to vector<4x128xi32>
    %48 = arith.select %46, %44, %47 : vector<4x128xi1>, vector<4x128xi32>
    %cst_10 = arith.constant dense<2147483647> : vector<128xi32>
    %49 = vector.multi_reduction <minsi>, %48, %cst_10 [0] : vector<4x128xi32> to vector<128xi32>
    %50 = vector.shape_cast %49 : vector<128xi32> to vector<1x128xi32>
    %c0_11 = arith.constant 0 : index
    %c0_12 = arith.constant 0 : index
    %c0_13 = arith.constant 0 : index
    %51 = vector.load %arg8[%c0_11, %c0_12, %c0_13] : memref<1x1x128xi32, #tpu.memory_space<vmem>>, vector<1x1x128xi32>
    %52 = vector.shape_cast %51 : vector<1x1x128xi32> to vector<1x128xi32>
    %53 = vector.shape_cast %50 : vector<1x128xi32> to vector<1x1x128xi32>
    tpu.vector_store %arg8[%c0_11, %c0_12, %c0_13], %53 {strides = array<i32>} : memref<1x1x128xi32, #tpu.memory_space<vmem>>, vector<1x1x128xi32>,
    %c0_14 = arith.constant 0 : index
    %c0_15 = arith.constant 0 : index
    %c0_16 = arith.constant 0 : index
    %54 = vector.load %arg7[%c0_14, %c0_15, %c0_16] : memref<1x1x128xf32, #tpu.memory_space<vmem>>, vector<1x1x128xf32>
    %55 = vector.shape_cast %54 : vector<1x1x128xf32> to vector<1x128xf32>
    %56 = vector.shape_cast %43 : vector<1x128xf32> to vector<1x1x128xf32>
    tpu.vector_store %arg7[%c0_14, %c0_15, %c0_16], %56 {strides = array<i32>} : memref<1x1x128xf32, #tpu.memory_space<vmem>>, vector<1x1x128xf32>,
    %cst_17 = arith.constant dense<0xFF800000> : vector<4xf32>
    %57 = vector.multi_reduction <maximumf>, %41, %cst_17 [1] : vector<4x128xf32> to vector<4xf32>
    %58 = vector.shape_cast %57 : vector<4xf32> to vector<4x1xf32>
    %59 = tpu.iota {dimensions = array<i32: 1>} : vector<4x128xi32>
    %60 = vector.broadcast %58 : vector<4x1xf32> to vector<4x128xf32>
    %61 = arith.cmpf oeq, %41, %60 : vector<4x128xf32>
    %c128_i32 = arith.constant 128 : i32
    %62 = vector.broadcast %c128_i32 : i32 to vector<4x128xi32>
    %63 = arith.select %61, %59, %62 : vector<4x128xi1>, vector<4x128xi32>
    %cst_18 = arith.constant dense<2147483647> : vector<4xi32>
    %64 = vector.multi_reduction <minsi>, %63, %cst_18 [1] : vector<4x128xi32> to vector<4xi32>
    %65 = vector.shape_cast %64 : vector<4xi32> to vector<4x1xi32>
    %c128_i32_19 = arith.constant 128 : i32
    %66 = arith.muli %arg1, %c128_i32_19 : i32
    %67 = vector.broadcast %66 : i32 to vector<4x1xi32>
    %68 = arith.addi %65, %67 : vector<4x1xi32>
    %c0_i32 = arith.constant 0 : i32
    %69 = arith.cmpi eq, %arg1, %c0_i32 : i32
    %70 = arith.extui %69 : i1 to i32
    %c0_i32_20 = arith.constant 0 : i32
    %71 = arith.cmpi ne, %70, %c0_i32_20 : i32
    scf.if %71 {
      %cst_66 = arith.constant -1.000000e+00 : f32
      %151 = vector.broadcast %cst_66 : f32 to vector<4x1xf32>
      %c0_67 = arith.constant 0 : index
      %c0_68 = arith.constant 0 : index
      %152 = vector.load %arg12[%c0_67, %c0_68] : memref<4x1xf32, #tpu.memory_space<vmem>>, vector<4x1xf32>
      tpu.vector_store %arg12[%c0_67, %c0_68], %151 {strides = array<i32>} : memref<4x1xf32, #tpu.memory_space<vmem>>, vector<4x1xf32>,
    } else {
    }
    %c0_21 = arith.constant 0 : index
    %c0_22 = arith.constant 0 : index
    %72 = vector.load %arg12[%c0_21, %c0_22] : memref<4x1xf32, #tpu.memory_space<vmem>>, vector<4x1xf32>
    %73 = arith.cmpf ogt, %58, %72 : vector<4x1xf32>
    %c0_23 = arith.constant 0 : index
    %c0_24 = arith.constant 0 : index
    %c0_25 = arith.constant 0 : index
    %74 = vector.load %arg9[%c0_23, %c0_24, %c0_25] : memref<1x4x1xi32, #tpu.memory_space<vmem>>, vector<1x4x1xi32>
    %75 = vector.shape_cast %74 : vector<1x4x1xi32> to vector<4x1xi32>
    %76 = arith.select %73, %68, %75 : vector<4x1xi1>, vector<4x1xi32>
    %c0_26 = arith.constant 0 : index
    %c0_27 = arith.constant 0 : index
    %c0_28 = arith.constant 0 : index
    %77 = vector.load %arg9[%c0_26, %c0_27, %c0_28] : memref<1x4x1xi32, #tpu.memory_space<vmem>>, vector<1x4x1xi32>
    %78 = vector.shape_cast %77 : vector<1x4x1xi32> to vector<4x1xi32>
    %79 = vector.shape_cast %76 : vector<4x1xi32> to vector<1x4x1xi32>
    tpu.vector_store %arg9[%c0_26, %c0_27, %c0_28], %79 {strides = array<i32>} : memref<1x4x1xi32, #tpu.memory_space<vmem>>, vector<1x4x1xi32>,
    %c0_29 = arith.constant 0 : index
    %c0_30 = arith.constant 0 : index
    %80 = vector.load %arg12[%c0_29, %c0_30] : memref<4x1xf32, #tpu.memory_space<vmem>>, vector<4x1xf32>
    %81 = arith.select %73, %58, %80 : vector<4x1xi1>, vector<4x1xf32>
    %c0_31 = arith.constant 0 : index
    %c0_32 = arith.constant 0 : index
    %82 = vector.load %arg12[%c0_31, %c0_32] : memref<4x1xf32, #tpu.memory_space<vmem>>, vector<4x1xf32>
    tpu.vector_store %arg12[%c0_31, %c0_32], %81 {strides = array<i32>} : memref<4x1xf32, #tpu.memory_space<vmem>>, vector<4x1xf32>,
    %c0_33 = arith.constant 0 : index
    %c0_34 = arith.constant 0 : index
    %c0_35 = arith.constant 0 : index
    %83 = vector.load %arg4[%c0_33, %c0_34, %c0_35] : memref<1x8x128xf32, #tpu.memory_space<vmem>>, vector<1x8x128xf32>
    %84 = vector.shape_cast %83 : vector<1x8x128xf32> to vector<8x128xf32>
    %cst_36 = arith.constant dense<0xFF800000> : vector<128xf32>
    %85 = vector.multi_reduction <maximumf>, %84, %cst_36 [0] : vector<8x128xf32> to vector<128xf32>
    %86 = vector.shape_cast %85 : vector<128xf32> to vector<1x128xf32>
    %87 = vector.broadcast %86 : vector<1x128xf32> to vector<8x128xf32>
    %88 = arith.subf %84, %87 : vector<8x128xf32>
    %89 = math.exp %88 : vector<8x128xf32>
    %cst_37 = arith.constant dense<0.000000e+00> : vector<128xf32>
    %90 = vector.multi_reduction <add>, %89, %cst_37 [0] : vector<8x128xf32> to vector<128xf32>
    %91 = vector.shape_cast %90 : vector<128xf32> to vector<1x128xf32>
    %92 = vector.broadcast %91 : vector<1x128xf32> to vector<8x128xf32>
    %93 = arith.divf %89, %92 : vector<8x128xf32>
    %94 = arith.truncf %93 : vector<8x128xf32> to vector<8x128xbf16>
    %c0_38 = arith.constant 0 : index
    %c0_39 = arith.constant 0 : index
    %c0_40 = arith.constant 0 : index
    %95 = vector.load %arg10[%c0_38, %c0_39, %c0_40] : memref<1x8x128xbf16, #tpu.memory_space<vmem>>, vector<1x8x128xbf16>
    %96 = vector.shape_cast %95 : vector<1x8x128xbf16> to vector<8x128xbf16>
    %97 = vector.shape_cast %94 : vector<8x128xbf16> to vector<1x8x128xbf16>
    tpu.vector_store %arg10[%c0_38, %c0_39, %c0_40], %97 {strides = array<i32>} : memref<1x8x128xbf16, #tpu.memory_space<vmem>>, vector<1x8x128xbf16>,
    %c0_41 = arith.constant 0 : index
    %c0_42 = arith.constant 0 : index
    %c0_43 = arith.constant 0 : index
    %98 = vector.load %arg5[%c0_41, %c0_42, %c0_43] : memref<1x4x128xf32, #tpu.memory_space<vmem>>, vector<1x4x128xf32>
    %99 = vector.shape_cast %98 : vector<1x4x128xf32> to vector<4x128xf32>
    %c0_44 = arith.constant 0 : index
    %c0_45 = arith.constant 0 : index
    %100 = vector.load %arg6[%c0_44, %c0_45] : memref<4x128xf32, #tpu.memory_space<vmem>>, vector<4x128xf32>
    %101 = vector.extract_strided_slice %100 {offsets = [0, 0], sizes = [1, 128], strides = [1, 1]} : vector<4x128xf32> to vector<1x128xf32>
    %102 = vector.extract_strided_slice %99 {offsets = [0, 0], sizes = [1, 128], strides = [1, 1]} : vector<4x128xf32> to vector<1x128xf32>
    %cst_46 = arith.constant 1.000000e-01 : f32
    %103 = vector.broadcast %cst_46 : f32 to vector<1x128xf32>
    %104 = arith.mulf %102, %103 : vector<1x128xf32>
    %105 = vector.extract_strided_slice %100 {offsets = [2, 0], sizes = [1, 128], strides = [1, 1]} : vector<4x128xf32> to vector<1x128xf32>
    %106 = arith.mulf %104, %105 : vector<1x128xf32>
    %107 = arith.addf %101, %106 : vector<1x128xf32>
    %108 = vector.extract_strided_slice %100 {offsets = [1, 0], sizes = [1, 128], strides = [1, 1]} : vector<4x128xf32> to vector<1x128xf32>
    %109 = vector.extract_strided_slice %99 {offsets = [1, 0], sizes = [1, 128], strides = [1, 1]} : vector<4x128xf32> to vector<1x128xf32>
    %cst_47 = arith.constant 1.000000e-01 : f32
    %110 = vector.broadcast %cst_47 : f32 to vector<1x128xf32>
    %111 = arith.mulf %109, %110 : vector<1x128xf32>
    %112 = vector.extract_strided_slice %100 {offsets = [3, 0], sizes = [1, 128], strides = [1, 1]} : vector<4x128xf32> to vector<1x128xf32>
    %113 = arith.mulf %111, %112 : vector<1x128xf32>
    %114 = arith.addf %108, %113 : vector<1x128xf32>
    %115 = vector.extract_strided_slice %100 {offsets = [2, 0], sizes = [1, 128], strides = [1, 1]} : vector<4x128xf32> to vector<1x128xf32>
    %116 = vector.extract_strided_slice %99 {offsets = [2, 0], sizes = [1, 128], strides = [1, 1]} : vector<4x128xf32> to vector<1x128xf32>
    %cst_48 = arith.constant 2.000000e-01 : f32
    %117 = vector.broadcast %cst_48 : f32 to vector<1x128xf32>
    %118 = arith.mulf %116, %117 : vector<1x128xf32>
    %119 = math.exp %118 : vector<1x128xf32>
    %120 = arith.mulf %115, %119 : vector<1x128xf32>
    %121 = vector.extract_strided_slice %100 {offsets = [3, 0], sizes = [1, 128], strides = [1, 1]} : vector<4x128xf32> to vector<1x128xf32>
    %122 = vector.extract_strided_slice %99 {offsets = [3, 0], sizes = [1, 128], strides = [1, 1]} : vector<4x128xf32> to vector<1x128xf32>
    %cst_49 = arith.constant 2.000000e-01 : f32
    %123 = vector.broadcast %cst_49 : f32 to vector<1x128xf32>
    %124 = arith.mulf %122, %123 : vector<1x128xf32>
    %125 = math.exp %124 : vector<1x128xf32>
    %126 = arith.mulf %121, %125 : vector<1x128xf32>
    %cst_50 = arith.constant 5.000000e-01 : f32
    %127 = vector.broadcast %cst_50 : f32 to vector<1x128xf32>
    %128 = arith.mulf %127, %120 : vector<1x128xf32>
    %129 = arith.subf %107, %128 : vector<1x128xf32>
    %c0_51 = arith.constant 0 : index
    %c0_52 = arith.constant 0 : index
    %c0_53 = arith.constant 0 : index
    %130 = vector.load %arg11[%c0_51, %c0_52, %c0_53] : memref<1x4x128xf32, #tpu.memory_space<vmem>>, vector<1x1x128xf32>
    %131 = vector.shape_cast %130 : vector<1x1x128xf32> to vector<1x128xf32>
    %132 = vector.shape_cast %129 : vector<1x128xf32> to vector<1x1x128xf32>
    tpu.vector_store %arg11[%c0_51, %c0_52, %c0_53], %132 {strides = array<i32>} : memref<1x4x128xf32, #tpu.memory_space<vmem>>, vector<1x1x128xf32>,
    %cst_54 = arith.constant 5.000000e-01 : f32
    %133 = vector.broadcast %cst_54 : f32 to vector<1x128xf32>
    %134 = arith.mulf %133, %126 : vector<1x128xf32>
    %135 = arith.subf %114, %134 : vector<1x128xf32>
    %c0_55 = arith.constant 0 : index
    %c1_56 = arith.constant 1 : index
    %c0_57 = arith.constant 0 : index
    %136 = vector.load %arg11[%c0_55, %c1_56, %c0_57] : memref<1x4x128xf32, #tpu.memory_space<vmem>>, vector<1x1x128xf32>
    %137 = vector.shape_cast %136 : vector<1x1x128xf32> to vector<1x128xf32>
    %138 = vector.shape_cast %135 : vector<1x128xf32> to vector<1x1x128xf32>
    tpu.vector_store %arg11[%c0_55, %c1_56, %c0_57], %138 {strides = array<i32>} : memref<1x4x128xf32, #tpu.memory_space<vmem>>, vector<1x1x128xf32>,
    %cst_58 = arith.constant 5.000000e-01 : f32
    %139 = vector.broadcast %cst_58 : f32 to vector<1x128xf32>
    %140 = arith.mulf %139, %120 : vector<1x128xf32>
    %141 = arith.addf %107, %140 : vector<1x128xf32>
    %c0_59 = arith.constant 0 : index
    %c2_60 = arith.constant 2 : index
    %c0_61 = arith.constant 0 : index
    %142 = vector.load %arg11[%c0_59, %c2_60, %c0_61] : memref<1x4x128xf32, #tpu.memory_space<vmem>>, vector<1x1x128xf32>
    %143 = vector.shape_cast %142 : vector<1x1x128xf32> to vector<1x128xf32>
    %144 = vector.shape_cast %141 : vector<1x128xf32> to vector<1x1x128xf32>
    tpu.vector_store %arg11[%c0_59, %c2_60, %c0_61], %144 {strides = array<i32>} : memref<1x4x128xf32, #tpu.memory_space<vmem>>, vector<1x1x128xf32>,
    %cst_62 = arith.constant 5.000000e-01 : f32
    %145 = vector.broadcast %cst_62 : f32 to vector<1x128xf32>
    %146 = arith.mulf %145, %126 : vector<1x128xf32>
    %147 = arith.addf %114, %146 : vector<1x128xf32>
    %c0_63 = arith.constant 0 : index
    %c3_64 = arith.constant 3 : index
    %c0_65 = arith.constant 0 : index
    %148 = vector.load %arg11[%c0_63, %c3_64, %c0_65] : memref<1x4x128xf32, #tpu.memory_space<vmem>>, vector<1x1x128xf32>
    %149 = vector.shape_cast %148 : vector<1x1x128xf32> to vector<1x128xf32>
    %150 = vector.shape_cast %147 : vector<1x128xf32> to vector<1x1x128xf32>
    tpu.vector_store %arg11[%c0_63, %c3_64, %c0_65], %150 {strides = array<i32>} : memref<1x4x128xf32, #tpu.memory_space<vmem>>, vector<1x1x128xf32>,
    return
  }
  func.func @transform_0(%arg0: i32, %arg1: i32) -> (i32, i32, i32) {
    %c0_i32 = arith.constant 0 : i32
    %c0_i32_0 = arith.constant 0 : i32
    %c0_i32_1 = arith.constant 0 : i32
    return %arg0, %c0_i32, %c0_i32_0 : i32, i32, i32
  }
  func.func @transform_1(%arg0: i32, %arg1: i32) -> (i32, i32) {
    %c0_i32 = arith.constant 0 : i32
    %c0_i32_0 = arith.constant 0 : i32
    return %c0_i32, %arg1 : i32, i32
  }
  func.func @transform_2(%arg0: i32, %arg1: i32) -> (i32, i32, i32) {
    %c0_i32 = arith.constant 0 : i32
    %c0_i32_0 = arith.constant 0 : i32
    return %arg0, %c0_i32, %arg1 : i32, i32, i32
  }
  func.func @transform_3(%arg0: i32, %arg1: i32) -> (i32, i32, i32) {
    %c0_i32 = arith.constant 0 : i32
    %c0_i32_0 = arith.constant 0 : i32
    return %arg0, %c0_i32, %arg1 : i32, i32, i32
  }
  func.func @transform_4(%arg0: i32, %arg1: i32) -> (i32, i32) {
    %c0_i32 = arith.constant 0 : i32
    %c0_i32_0 = arith.constant 0 : i32
    return %c0_i32, %arg1 : i32, i32
  }
  func.func @transform_5(%arg0: i32, %arg1: i32) -> (i32, i32, i32) {
    %c0_i32 = arith.constant 0 : i32
    %c0_i32_0 = arith.constant 0 : i32
    return %arg0, %c0_i32, %arg1 : i32, i32, i32
  }
  func.func @transform_6(%arg0: i32, %arg1: i32) -> (i32, i32, i32) {
    %c0_i32 = arith.constant 0 : i32
    %c0_i32_0 = arith.constant 0 : i32
    return %arg0, %c0_i32, %arg1 : i32, i32, i32
  }
  func.func @transform_7(%arg0: i32, %arg1: i32) -> (i32, i32, i32) {
    %c0_i32 = arith.constant 0 : i32
    %c0_i32_0 = arith.constant 0 : i32
    %c0_i32_1 = arith.constant 0 : i32
    return %arg0, %c0_i32, %c0_i32_0 : i32, i32, i32
  }
  func.func @transform_8(%arg0: i32, %arg1: i32) -> (i32, i32, i32) {
    %c0_i32 = arith.constant 0 : i32
    %c0_i32_0 = arith.constant 0 : i32
    return %arg0, %c0_i32, %arg1 : i32, i32, i32
  }
  func.func @transform_9(%arg0: i32, %arg1: i32) -> (i32, i32, i32) {
    %c0_i32 = arith.constant 0 : i32
    %c0_i32_0 = arith.constant 0 : i32
    return %arg0, %c0_i32, %arg1 : i32, i32, i32
  }
}

module attributes {stable_mosaic.version = 11 : i64} {
  func.func @_loss_kernel(%arg0: i32, %arg1: i32, %arg2: memref<1x8x128xf32, #tpu.memory_space<vmem>>, %arg3: memref<1x4x128xf32, #tpu.memory_space<vmem>>, %arg4: memref<1x6x128xf32, #tpu.memory_space<vmem>>, %arg5: memref<4x128xf32, #tpu.memory_space<vmem>>, %arg6: memref<1x3x128xf32, #tpu.memory_space<vmem>>) attributes {dimension_semantics = [#tpu.dimension_semantics<parallel>, #tpu.dimension_semantics<arbitrary>], iteration_bounds = array<i64: 2, 1>, scalar_prefetch = 0 : i64, scratch_operands = 0 : i64, tpu.core_type = #tpu.core_type<tc>, window_params = [{transform_indices = @transform_0, window_bounds = array<i64: 1, 8, 128>}, {transform_indices = @transform_1, window_bounds = array<i64: 1, 4, 128>}, {transform_indices = @transform_2, window_bounds = array<i64: 1, 6, 128>}, {transform_indices = @transform_3, window_bounds = array<i64: 4, 128>}, {transform_indices = @transform_4, window_bounds = array<i64: 1, 3, 128>}]} {
    %c0 = arith.constant 0 : index
    %c0_0 = arith.constant 0 : index
    %c0_1 = arith.constant 0 : index
    %0 = vector.load %arg2[%c0, %c0_0, %c0_1] : memref<1x8x128xf32, #tpu.memory_space<vmem>>, vector<1x8x128xf32>
    %1 = vector.shape_cast %0 : vector<1x8x128xf32> to vector<8x128xf32>
    %cst = arith.constant dense<0xFF800000> : vector<128xf32>
    %2 = vector.multi_reduction <maximumf>, %1, %cst [0] : vector<8x128xf32> to vector<128xf32>
    %3 = vector.shape_cast %2 : vector<128xf32> to vector<1x128xf32>
    %4 = vector.broadcast %3 : vector<1x128xf32> to vector<8x128xf32>
    %5 = arith.subf %1, %4 : vector<8x128xf32>
    %6 = math.exp %5 : vector<8x128xf32>
    %cst_2 = arith.constant dense<0.000000e+00> : vector<128xf32>
    %7 = vector.multi_reduction <add>, %6, %cst_2 [0] : vector<8x128xf32> to vector<128xf32>
    %8 = vector.shape_cast %7 : vector<128xf32> to vector<1x128xf32>
    %9 = vector.broadcast %8 : vector<1x128xf32> to vector<8x128xf32>
    %10 = arith.divf %6, %9 : vector<8x128xf32>
    %11 = tpu.iota {dimensions = array<i32: 0>} : vector<8x128xi32>
    %cst_3 = arith.constant 1.000000e-01 : f32
    %12 = vector.broadcast %cst_3 : f32 to vector<8x128xf32>
    %13 = arith.cmpf ogt, %10, %12 : vector<8x128xf32>
    %c0_i32 = arith.constant 0 : i32
    %14 = vector.broadcast %c0_i32 : i32 to vector<8x128xi32>
    %15 = arith.cmpi sgt, %11, %14 : vector<8x128xi32>
    %16 = arith.andi %13, %15 : vector<8x128xi1>
    %cst_4 = arith.constant 0.000000e+00 : f32
    %17 = vector.broadcast %cst_4 : f32 to vector<8x128xf32>
    %18 = arith.select %16, %10, %17 : vector<8x128xi1>, vector<8x128xf32>
    %cst_5 = arith.constant dense<0.000000e+00> : vector<128xf32>
    %19 = vector.multi_reduction <add>, %18, %cst_5 [0] : vector<8x128xf32> to vector<128xf32>
    %20 = vector.shape_cast %19 : vector<128xf32> to vector<1x128xf32>
    %cst_6 = arith.constant 0.000000e+00 : f32
    %21 = vector.broadcast %cst_6 : f32 to vector<1x128xf32>
    %22 = arith.cmpf one, %20, %21 : vector<1x128xf32>
    %23 = arith.extui %22 : vector<1x128xi1> to vector<1x128xi32>
    %24 = arith.sitofp %23 : vector<1x128xi32> to vector<1x128xf32>
    %cst_7 = arith.constant dense<0xFF800000> : vector<128xf32>
    %25 = vector.multi_reduction <maximumf>, %18, %cst_7 [0] : vector<8x128xf32> to vector<128xf32>
    %26 = vector.shape_cast %25 : vector<128xf32> to vector<1x128xf32>
    %27 = vector.broadcast %26 : vector<1x128xf32> to vector<8x128xf32>
    %28 = arith.subf %18, %27 : vector<8x128xf32>
    %29 = math.exp %28 : vector<8x128xf32>
    %cst_8 = arith.constant dense<0.000000e+00> : vector<128xf32>
    %30 = vector.multi_reduction <add>, %29, %cst_8 [0] : vector<8x128xf32> to vector<128xf32>
    %31 = vector.shape_cast %30 : vector<128xf32> to vector<1x128xf32>
    %32 = math.log %31 : vector<1x128xf32>
    %33 = arith.addf %32, %26 : vector<1x128xf32>
    %c0_9 = arith.constant 0 : index
    %c0_10 = arith.constant 0 : index
    %c0_11 = arith.constant 0 : index
    %34 = vector.load %arg4[%c0_9, %c0_10, %c0_11] : memref<1x6x128xf32, #tpu.memory_space<vmem>>, vector<1x1x128xf32>
    %35 = vector.shape_cast %34 : vector<1x1x128xf32> to vector<1x128xf32>
    %36 = arith.fptosi %35 : vector<1x128xf32> to vector<1x128xi32>
    %37 = vector.broadcast %36 : vector<1x128xi32> to vector<8x128xi32>
    %38 = arith.cmpi eq, %11, %37 : vector<8x128xi32>
    %cst_12 = arith.constant 0.000000e+00 : f32
    %39 = vector.broadcast %cst_12 : f32 to vector<8x128xf32>
    %40 = arith.select %38, %18, %39 : vector<8x128xi1>, vector<8x128xf32>
    %cst_13 = arith.constant dense<0.000000e+00> : vector<128xf32>
    %41 = vector.multi_reduction <add>, %40, %cst_13 [0] : vector<8x128xf32> to vector<128xf32>
    %42 = vector.shape_cast %41 : vector<128xf32> to vector<1x128xf32>
    %43 = arith.subf %33, %42 : vector<1x128xf32>
    %44 = arith.mulf %43, %24 : vector<1x128xf32>
    %c0_14 = arith.constant 0 : index
    %c1 = arith.constant 1 : index
    %c0_15 = arith.constant 0 : index
    %45 = vector.load %arg4[%c0_14, %c1, %c0_15] : memref<1x6x128xf32, #tpu.memory_space<vmem>>, vector<1x1x128xf32>
    %46 = vector.shape_cast %45 : vector<1x1x128xf32> to vector<1x128xf32>
    %c0_16 = arith.constant 0 : index
    %c2 = arith.constant 2 : index
    %c0_17 = arith.constant 0 : index
    %47 = vector.load %arg4[%c0_16, %c2, %c0_17] : memref<1x6x128xf32, #tpu.memory_space<vmem>>, vector<1x4x128xf32>
    %48 = vector.shape_cast %47 : vector<1x4x128xf32> to vector<4x128xf32>
    %c0_18 = arith.constant 0 : index
    %c0_19 = arith.constant 0 : index
    %49 = vector.load %arg5[%c0_18, %c0_19] : memref<4x128xf32, #tpu.memory_space<vmem>>, vector<4x128xf32>
    %c0_20 = arith.constant 0 : index
    %c0_21 = arith.constant 0 : index
    %c0_22 = arith.constant 0 : index
    %50 = vector.load %arg3[%c0_20, %c0_21, %c0_22] : memref<1x4x128xf32, #tpu.memory_space<vmem>>, vector<1x4x128xf32>
    %51 = vector.shape_cast %50 : vector<1x4x128xf32> to vector<4x128xf32>
    %52 = vector.extract_strided_slice %48 {offsets = [0, 0], sizes = [1, 128], strides = [1, 1]} : vector<4x128xf32> to vector<1x128xf32>
    %53 = vector.extract_strided_slice %48 {offsets = [2, 0], sizes = [1, 128], strides = [1, 1]} : vector<4x128xf32> to vector<1x128xf32>
    %54 = arith.addf %52, %53 : vector<1x128xf32>
    %cst_23 = arith.constant 5.000000e-01 : f32
    %55 = vector.broadcast %cst_23 : f32 to vector<1x128xf32>
    %56 = arith.mulf %54, %55 : vector<1x128xf32>
    %57 = vector.extract_strided_slice %49 {offsets = [0, 0], sizes = [1, 128], strides = [1, 1]} : vector<4x128xf32> to vector<1x128xf32>
    %58 = arith.subf %56, %57 : vector<1x128xf32>
    %59 = vector.extract_strided_slice %49 {offsets = [2, 0], sizes = [1, 128], strides = [1, 1]} : vector<4x128xf32> to vector<1x128xf32>
    %cst_24 = arith.constant 1.000000e-01 : f32
    %60 = vector.broadcast %cst_24 : f32 to vector<1x128xf32>
    %61 = arith.mulf %59, %60 : vector<1x128xf32>
    %62 = arith.divf %58, %61 : vector<1x128xf32>
    %63 = vector.extract_strided_slice %48 {offsets = [1, 0], sizes = [1, 128], strides = [1, 1]} : vector<4x128xf32> to vector<1x128xf32>
    %64 = vector.extract_strided_slice %48 {offsets = [3, 0], sizes = [1, 128], strides = [1, 1]} : vector<4x128xf32> to vector<1x128xf32>
    %65 = arith.addf %63, %64 : vector<1x128xf32>
    %cst_25 = arith.constant 5.000000e-01 : f32
    %66 = vector.broadcast %cst_25 : f32 to vector<1x128xf32>
    %67 = arith.mulf %65, %66 : vector<1x128xf32>
    %68 = vector.extract_strided_slice %49 {offsets = [1, 0], sizes = [1, 128], strides = [1, 1]} : vector<4x128xf32> to vector<1x128xf32>
    %69 = arith.subf %67, %68 : vector<1x128xf32>
    %70 = vector.extract_strided_slice %49 {offsets = [3, 0], sizes = [1, 128], strides = [1, 1]} : vector<4x128xf32> to vector<1x128xf32>
    %cst_26 = arith.constant 1.000000e-01 : f32
    %71 = vector.broadcast %cst_26 : f32 to vector<1x128xf32>
    %72 = arith.mulf %70, %71 : vector<1x128xf32>
    %73 = arith.divf %69, %72 : vector<1x128xf32>
    %74 = vector.extract_strided_slice %48 {offsets = [2, 0], sizes = [1, 128], strides = [1, 1]} : vector<4x128xf32> to vector<1x128xf32>
    %75 = vector.extract_strided_slice %48 {offsets = [0, 0], sizes = [1, 128], strides = [1, 1]} : vector<4x128xf32> to vector<1x128xf32>
    %76 = arith.subf %74, %75 : vector<1x128xf32>
    %cst_27 = arith.constant 9.99999997E-7 : f32
    %77 = vector.broadcast %cst_27 : f32 to vector<1x128xf32>
    %78 = arith.maximumf %76, %77 : vector<1x128xf32>
    %79 = vector.extract_strided_slice %49 {offsets = [2, 0], sizes = [1, 128], strides = [1, 1]} : vector<4x128xf32> to vector<1x128xf32>
    %80 = arith.divf %78, %79 : vector<1x128xf32>
    %81 = math.log %80 : vector<1x128xf32>
    %cst_28 = arith.constant 2.000000e-01 : f32
    %82 = vector.broadcast %cst_28 : f32 to vector<1x128xf32>
    %83 = arith.divf %81, %82 : vector<1x128xf32>
    %84 = vector.extract_strided_slice %48 {offsets = [3, 0], sizes = [1, 128], strides = [1, 1]} : vector<4x128xf32> to vector<1x128xf32>
    %85 = vector.extract_strided_slice %48 {offsets = [1, 0], sizes = [1, 128], strides = [1, 1]} : vector<4x128xf32> to vector<1x128xf32>
    %86 = arith.subf %84, %85 : vector<1x128xf32>
    %cst_29 = arith.constant 9.99999997E-7 : f32
    %87 = vector.broadcast %cst_29 : f32 to vector<1x128xf32>
    %88 = arith.maximumf %86, %87 : vector<1x128xf32>
    %89 = vector.extract_strided_slice %49 {offsets = [3, 0], sizes = [1, 128], strides = [1, 1]} : vector<4x128xf32> to vector<1x128xf32>
    %90 = arith.divf %88, %89 : vector<1x128xf32>
    %91 = math.log %90 : vector<1x128xf32>
    %cst_30 = arith.constant 2.000000e-01 : f32
    %92 = vector.broadcast %cst_30 : f32 to vector<1x128xf32>
    %93 = arith.divf %91, %92 : vector<1x128xf32>
    %94 = vector.broadcast %46 : vector<1x128xf32> to vector<4x128xf32>
    %95 = arith.mulf %51, %94 : vector<4x128xf32>
    %96 = vector.extract_strided_slice %95 {offsets = [0, 0], sizes = [1, 128], strides = [1, 1]} : vector<4x128xf32> to vector<1x128xf32>
    %97 = arith.subf %96, %62 : vector<1x128xf32>
    %98 = math.absf %97 : vector<1x128xf32>
    %cst_31 = arith.constant 1.000000e+00 : f32
    %99 = vector.broadcast %cst_31 : f32 to vector<1x128xf32>
    %100 = arith.cmpf olt, %98, %99 : vector<1x128xf32>
    %cst_32 = arith.constant 5.000000e-01 : f32
    %101 = vector.broadcast %cst_32 : f32 to vector<1x128xf32>
    %102 = arith.mulf %101, %97 : vector<1x128xf32>
    %103 = arith.mulf %102, %97 : vector<1x128xf32>
    %cst_33 = arith.constant 5.000000e-01 : f32
    %104 = vector.broadcast %cst_33 : f32 to vector<1x128xf32>
    %105 = arith.subf %98, %104 : vector<1x128xf32>
    %106 = arith.select %100, %103, %105 : vector<1x128xi1>, vector<1x128xf32>
    %107 = vector.extract_strided_slice %95 {offsets = [1, 0], sizes = [1, 128], strides = [1, 1]} : vector<4x128xf32> to vector<1x128xf32>
    %108 = arith.subf %107, %73 : vector<1x128xf32>
    %109 = math.absf %108 : vector<1x128xf32>
    %cst_34 = arith.constant 1.000000e+00 : f32
    %110 = vector.broadcast %cst_34 : f32 to vector<1x128xf32>
    %111 = arith.cmpf olt, %109, %110 : vector<1x128xf32>
    %cst_35 = arith.constant 5.000000e-01 : f32
    %112 = vector.broadcast %cst_35 : f32 to vector<1x128xf32>
    %113 = arith.mulf %112, %108 : vector<1x128xf32>
    %114 = arith.mulf %113, %108 : vector<1x128xf32>
    %cst_36 = arith.constant 5.000000e-01 : f32
    %115 = vector.broadcast %cst_36 : f32 to vector<1x128xf32>
    %116 = arith.subf %109, %115 : vector<1x128xf32>
    %117 = arith.select %111, %114, %116 : vector<1x128xi1>, vector<1x128xf32>
    %118 = arith.addf %106, %117 : vector<1x128xf32>
    %119 = vector.extract_strided_slice %95 {offsets = [2, 0], sizes = [1, 128], strides = [1, 1]} : vector<4x128xf32> to vector<1x128xf32>
    %120 = arith.subf %119, %83 : vector<1x128xf32>
    %121 = math.absf %120 : vector<1x128xf32>
    %cst_37 = arith.constant 1.000000e+00 : f32
    %122 = vector.broadcast %cst_37 : f32 to vector<1x128xf32>
    %123 = arith.cmpf olt, %121, %122 : vector<1x128xf32>
    %cst_38 = arith.constant 5.000000e-01 : f32
    %124 = vector.broadcast %cst_38 : f32 to vector<1x128xf32>
    %125 = arith.mulf %124, %120 : vector<1x128xf32>
    %126 = arith.mulf %125, %120 : vector<1x128xf32>
    %cst_39 = arith.constant 5.000000e-01 : f32
    %127 = vector.broadcast %cst_39 : f32 to vector<1x128xf32>
    %128 = arith.subf %121, %127 : vector<1x128xf32>
    %129 = arith.select %123, %126, %128 : vector<1x128xi1>, vector<1x128xf32>
    %130 = arith.addf %118, %129 : vector<1x128xf32>
    %131 = vector.extract_strided_slice %95 {offsets = [3, 0], sizes = [1, 128], strides = [1, 1]} : vector<4x128xf32> to vector<1x128xf32>
    %132 = arith.subf %131, %93 : vector<1x128xf32>
    %133 = math.absf %132 : vector<1x128xf32>
    %cst_40 = arith.constant 1.000000e+00 : f32
    %134 = vector.broadcast %cst_40 : f32 to vector<1x128xf32>
    %135 = arith.cmpf olt, %133, %134 : vector<1x128xf32>
    %cst_41 = arith.constant 5.000000e-01 : f32
    %136 = vector.broadcast %cst_41 : f32 to vector<1x128xf32>
    %137 = arith.mulf %136, %132 : vector<1x128xf32>
    %138 = arith.mulf %137, %132 : vector<1x128xf32>
    %cst_42 = arith.constant 5.000000e-01 : f32
    %139 = vector.broadcast %cst_42 : f32 to vector<1x128xf32>
    %140 = arith.subf %133, %139 : vector<1x128xf32>
    %141 = arith.select %135, %138, %140 : vector<1x128xi1>, vector<1x128xf32>
    %142 = arith.addf %130, %141 : vector<1x128xf32>
    %143 = arith.mulf %142, %24 : vector<1x128xf32>
    %c0_i32_43 = arith.constant 0 : i32
    %144 = arith.cmpi eq, %arg1, %c0_i32_43 : i32
    %145 = arith.extui %144 : i1 to i32
    %c0_i32_44 = arith.constant 0 : i32
    %146 = arith.cmpi ne, %145, %c0_i32_44 : i32
    scf.if %146 {
      %cst_63 = arith.constant 0.000000e+00 : f32
      %165 = vector.broadcast %cst_63 : f32 to vector<1x3x128xf32>
      %c0_64 = arith.constant 0 : index
      %c0_65 = arith.constant 0 : index
      %c0_66 = arith.constant 0 : index
      %166 = vector.load %arg6[%c0_64, %c0_65, %c0_66] : memref<1x3x128xf32, #tpu.memory_space<vmem>>, vector<1x3x128xf32>
      tpu.vector_store %arg6[%c0_64, %c0_65, %c0_66], %165 {strides = array<i32>} : memref<1x3x128xf32, #tpu.memory_space<vmem>>, vector<1x3x128xf32>,
    } else {
    }
    %c0_45 = arith.constant 0 : index
    %c0_46 = arith.constant 0 : index
    %c0_47 = arith.constant 0 : index
    %147 = vector.load %arg6[%c0_45, %c0_46, %c0_47] : memref<1x3x128xf32, #tpu.memory_space<vmem>>, vector<1x1x128xf32>
    %148 = vector.shape_cast %147 : vector<1x1x128xf32> to vector<1x128xf32>
    %149 = arith.addf %148, %143 : vector<1x128xf32>
    %c0_48 = arith.constant 0 : index
    %c0_49 = arith.constant 0 : index
    %c0_50 = arith.constant 0 : index
    %150 = vector.load %arg6[%c0_48, %c0_49, %c0_50] : memref<1x3x128xf32, #tpu.memory_space<vmem>>, vector<1x1x128xf32>
    %151 = vector.shape_cast %150 : vector<1x1x128xf32> to vector<1x128xf32>
    %152 = vector.shape_cast %149 : vector<1x128xf32> to vector<1x1x128xf32>
    tpu.vector_store %arg6[%c0_48, %c0_49, %c0_50], %152 {strides = array<i32>} : memref<1x3x128xf32, #tpu.memory_space<vmem>>, vector<1x1x128xf32>,
    %c0_51 = arith.constant 0 : index
    %c1_52 = arith.constant 1 : index
    %c0_53 = arith.constant 0 : index
    %153 = vector.load %arg6[%c0_51, %c1_52, %c0_53] : memref<1x3x128xf32, #tpu.memory_space<vmem>>, vector<1x1x128xf32>
    %154 = vector.shape_cast %153 : vector<1x1x128xf32> to vector<1x128xf32>
    %155 = arith.addf %154, %44 : vector<1x128xf32>
    %c0_54 = arith.constant 0 : index
    %c1_55 = arith.constant 1 : index
    %c0_56 = arith.constant 0 : index
    %156 = vector.load %arg6[%c0_54, %c1_55, %c0_56] : memref<1x3x128xf32, #tpu.memory_space<vmem>>, vector<1x1x128xf32>
    %157 = vector.shape_cast %156 : vector<1x1x128xf32> to vector<1x128xf32>
    %158 = vector.shape_cast %155 : vector<1x128xf32> to vector<1x1x128xf32>
    tpu.vector_store %arg6[%c0_54, %c1_55, %c0_56], %158 {strides = array<i32>} : memref<1x3x128xf32, #tpu.memory_space<vmem>>, vector<1x1x128xf32>,
    %c0_57 = arith.constant 0 : index
    %c2_58 = arith.constant 2 : index
    %c0_59 = arith.constant 0 : index
    %159 = vector.load %arg6[%c0_57, %c2_58, %c0_59] : memref<1x3x128xf32, #tpu.memory_space<vmem>>, vector<1x1x128xf32>
    %160 = vector.shape_cast %159 : vector<1x1x128xf32> to vector<1x128xf32>
    %161 = arith.addf %160, %24 : vector<1x128xf32>
    %c0_60 = arith.constant 0 : index
    %c2_61 = arith.constant 2 : index
    %c0_62 = arith.constant 0 : index
    %162 = vector.load %arg6[%c0_60, %c2_61, %c0_62] : memref<1x3x128xf32, #tpu.memory_space<vmem>>, vector<1x1x128xf32>
    %163 = vector.shape_cast %162 : vector<1x1x128xf32> to vector<1x128xf32>
    %164 = vector.shape_cast %161 : vector<1x128xf32> to vector<1x1x128xf32>
    tpu.vector_store %arg6[%c0_60, %c2_61, %c0_62], %164 {strides = array<i32>} : memref<1x3x128xf32, #tpu.memory_space<vmem>>, vector<1x1x128xf32>,
    return
  }
  func.func @transform_0(%arg0: i32, %arg1: i32) -> (i32, i32, i32) {
    %c0_i32 = arith.constant 0 : i32
    %c0_i32_0 = arith.constant 0 : i32
    return %arg0, %c0_i32, %arg1 : i32, i32, i32
  }
  func.func @transform_1(%arg0: i32, %arg1: i32) -> (i32, i32, i32) {
    %c0_i32 = arith.constant 0 : i32
    %c0_i32_0 = arith.constant 0 : i32
    return %arg0, %c0_i32, %arg1 : i32, i32, i32
  }
  func.func @transform_2(%arg0: i32, %arg1: i32) -> (i32, i32, i32) {
    %c0_i32 = arith.constant 0 : i32
    %c0_i32_0 = arith.constant 0 : i32
    return %arg0, %c0_i32, %arg1 : i32, i32, i32
  }
  func.func @transform_3(%arg0: i32, %arg1: i32) -> (i32, i32) {
    %c0_i32 = arith.constant 0 : i32
    %c0_i32_0 = arith.constant 0 : i32
    return %c0_i32, %arg1 : i32, i32
  }
  func.func @transform_4(%arg0: i32, %arg1: i32) -> (i32, i32, i32) {
    %c0_i32 = arith.constant 0 : i32
    %c0_i32_0 = arith.constant 0 : i32
    %c0_i32_1 = arith.constant 0 : i32
    return %arg0, %c0_i32, %c0_i32_0 : i32, i32, i32
  }
}

</mosaic_0001>

<bundles_post_ra>
// kernel: custom-call.30
= control target key start
LH: loop header
LB: loop body
LE: loop exit
PB: predicated region body
PF: predicated region fallthrough
CT: control target
= control target key end

     0   :  { %s6_s0 = inlined_call_operand.vmem [shape: pred[2,7,20], index: 0, kind: output, shape index: {}]  }

// kernel: _forward_impl.2
= control target key start
LH: loop header
LB: loop body
LE: loop exit
PB: predicated region body
PF: predicated region fallthrough
CT: control target
= control target key end

     0   :  { %s1092_s30 = smov 0   ;;  %s1094_s10 = smov 0   ;;  %s1182_s0 = inlined_call_operand.vmem [shape: f32[2,4,4], index: 0, kind: input, shape index: {}]   ;;  %s1183_s1 = inlined_call_operand.vmem [shape: f32[4,128], index: 1, kind: input, shape index: {}]   ;;  %s1184_s2 = inlined_call_operand.vmem [shape: f32[2,8,128], index: 2, kind: input, shape index: {}]   ;;  %s1185_s3 = inlined_call_operand.vmem [shape: f32[2,4,128], index: 3, kind: input, shape index: {}]   ;;  %s1186_s4 = inlined_call_operand.vmem [shape: f32[4,128], index: 4, kind: input, shape index: {}]   ;;  %s1187_s5 = inlined_call_operand.vmem [shape: f32[2,1,128], index: 5, kind: output, shape index: {0}]   ;;  %s1188_s6 = inlined_call_operand.vmem [shape: s32[2,1,128], index: 6, kind: output, shape index: {1}]   ;;  %s1189_s7 = inlined_call_operand.vmem [shape: s32[2,4,1], index: 7, kind: output, shape index: {2}]   ;;  %s1190_s8 = inlined_call_operand.vmem [shape: bf16[2,8,128], index: 8, kind: output, shape index: {3}]   ;;  %s1191_s9 = inlined_call_operand.vmem [shape: f32[2,4,128], index: 9, kind: output, shape index: {4}]  }
   0x1   :  { %s1096_s11 = smov 0  }
   0x2 LB: > { %s32_s12 = sadd.s32 1, %s1029_s10  ;;  %p957_p0 = scmp.ge.s32.totalorder %s1033_s11, 1  ;;  %s1033_s11 = sphi %s1096_s11, %s20_s11   ;;  %s1029_s10 = sphi %s1094_s10, %s1193_s10   ;;  %s1025_s30 = sphi %s1092_s30, %s1192_s30  }
   0x3   : > { %p34_p1 = scmp.ge.s32.totalorder %s32_s12, 2  ;;  %p361_p2 = scmp.lt.s32.totalorder %s1033_s11, 3 }
   0x5   : > { %s1195_s12 = smov (%p34_p1, %s32_s12), 0  ;;  %p362_p3 = pnand %p957_p0, %p361_p2 }
   0x6   : > { %p443_p4 = scmp.lt.s32.totalorder (!%p362_p3), %s1025_s30, 1  ;;  %v1035_v0 = vmov (!%p362_p3), 2   ;;  %v1036_v1 = vmov (!%p362_p3), 3   ;;  %s1037_s24 = smov (!%p362_p3), 2   ;;  %v1038_v10 = vmov (!%p362_p3), 0   ;;  %v1039_v14 = vmov (!%p362_p3), 1  }
   0x7   : > { %365 = sbr.rel (%p362_p3) target bundleno = 841 (0x349), region = 40  ;;  %997 = vset.pattern.permute.xlu1 (!%p362_p3), %v1035_v0  ;;  %999 = vset.pattern.permute.xlu0 (!%p362_p3), %v1036_v1  ;;  %v656_v12 = vld [vmem:[%s1186_s4] sm:$0xf] (!%p362_p3)  ;;  %vm624_vm0 = vcmask (!%p362_p3), 3072   ;;  %v1041_v42 = vmov (!%p362_p3), -1.0   ;;  %v509_v43 = vlaneseq (!%p362_p3)  ;;  %vm572_vm1 = vcmask (!%p362_p3), 1043456  }
   0x8   : > { %v659_v17 = vrot.slane (!%p362_p3), %v656_v12, 2  ;;  %625 = vst.msk [vmem:[#allocation2] sm:$0xf] (!%p362_p3), %vm624_vm0, %v1041_v42  ;;  %v502_v47 = vld [vmem:[%s1183_s1 + $0x2] sm:$0x1] (!%p362_p3) }
   0x9   : > { %v510_v45 = vshrl.u32 (!%p362_p3), %v509_v43, 7  ;;  %v500_v49 = vld [vmem:[%s1183_s1] sm:$0x1] (!%p362_p3)  ;;  %v501_v50 = vld [vmem:[%s1183_s1 + $0x1] sm:$0x1] (!%p362_p3) }
   0xa   : > { %v503_v51 = vld [vmem:[%s1183_s1 + $0x3] sm:$0x1] (!%p362_p3)  ;;  %v555_v58 = vsub.f32 (!%p362_p3), %v502_v47, %v500_v49 }
   0xb   : > { %v511_v48 = vsub.s32 (!%p362_p3), 0, %v510_v45  ;;  %v556_v59 = vsub.f32 (!%p362_p3), %v503_v51, %v501_v50 }
   0xd   : > { %v512_v52 = vrot.slane (!%p362_p3), %v502_v47, %v511_v48  ;;  %v521_v53 = vrot.slane (!%p362_p3), %v500_v49, %v511_v48  ;;  %v541_v54 = vrot.slane (!%p362_p3), %v501_v50, %v511_v48  ;;  %v532_v55 = vrot.slane (!%p362_p3), %v503_v51, %v511_v48 }
   0xe   : > { %s1197_s30 = smov (!%p443_p4, %s1025_s30), 1 }
   0xf   : > { %s1114_s13 = sshll.u32 %s1197_s30, 2  ;;  %s959_s14 = sshll.u32 %s1197_s30, 3 }
  0x10   : > { %s446_s17 = scalar_lea.vmem %s1182_s0, %s1114_s13  ;;  %s457_s20 = scalar_lea.vmem %s1184_s2, %s959_s14 }
  0x11   : > { %s464_s23 = scalar_lea.vmem %s1185_s3, %s1114_s13  ;;  %v499_v2 = vld [vmem:[%s446_s17] sm:$0xf]  ;;  %s498_s29 = scalar_lea.vmem %s1191_s9, %s1114_s13 }
  0x12   : > { %v635_v3 = vld [vmem:[%s457_s20] sm:$0xff]  ;;  %546 = vrot.lane.b32.xlu0 %v499_v2, %s1037_s24  ;;  %506 = vperm.xlu1 %997, %v499_v2   ;;  %s491_s16 = scalar_lea.vmem %s1190_s8, %s1114_s13  ;;  %s1040_s17 = smov 127  }
  0x13   : > { %v636_v4 = vrot.slane %v635_v3, 4  ;;  %v655_v5 = vld [vmem:[%s464_s23] sm:$0xf]  ;;  %s474_s28 = scalar_lea.vmem %s1187_s5, %s1197_s30  ;;  %s480_s15 = scalar_lea.vmem %s1188_s6, %s1197_s30 }
  0x14   : > { %v663_v6 = vmul.f32 0.2, %v655_v5  ;;  %v657_v16 = vmul.f32 0.1, %v655_v5 }
  0x15   : > { %v637_v7 = vmax.f32 %v635_v3, %v636_v4 }
  0x16   : > { %v664_v8 = vmul.f32 1.442695, %v663_v6  ;;  %998 = vset.pattern.permute.xlu1 %v1038_v10  ;;  %v661_v20 = vmul.f32 %v659_v17, %v657_v16 }
  0x17   : > { %v638_v9 = vrot.slane %v637_v7, 2  ;;  %515 = vperm.xlu1 %998, %v499_v2  }
  0x18   : > { %1003 = vpow2.f32 %v664_v8  ;;  %v662_v23 = vadd.f32 %v661_v20, %v656_v12 }
  0x19   : > { %v639_v11 = vmax.f32 %v637_v7, %v638_v9 }
  0x1b   : > { %v640_v13 = vrot.slane %v639_v11, 1  ;;  %1000 = vset.pattern.permute.xlu1 %v1039_v14 }
  0x1c   : > { %535 = vperm.xlu1 %1000, %v499_v2  }
  0x1d   : > { %v641_v15 = vmax.f32 %v639_v11, %v640_v13 }
  0x1f   : > { %v642_v18 = vsub.f32 %v635_v3, %v641_v15 }
  0x20   : > { %1001 = vset.pattern.permute.xlu1 %v1035_v0 }
  0x21   : > { %v643_v19 = vmul.f32 1.442695, %v642_v18 }
  0x22   : > { %v1004_v21 = vpop.eup %1003 }
  0x23   : > { %1005 = vpow2.f32 %v643_v19  ;;  %v666_v22 = vmul.f32 %v1004_v21, %v656_v12 }
  0x25   : > { %v667_v24 = vmul.f32 0.5, %v666_v22 }
  0x27   : > { %v669_v25 = vrot.slane %v667_v24, 2 }
  0x29   : > { %v671_v26 = vsub.f32 %v662_v23, %v669_v25  ;;  %v674_v27 = vadd.f32 %v669_v25, %v662_v23 }
  0x2b   : > { %672 = vst [vmem:[%s498_s29] sm:$0x3] %v671_v26   ;;  %675 = vst [vmem:[%s498_s29 + $0x2] sm:$0x3] %v674_v27  }
  0x2d   : > { %v1006_v28 = vpop.eup %1005 }
  0x2e   : > { %v645_v29 = vrot.slane %v1006_v28, 4 }
  0x30   : > { %v646_v30 = vadd.f32 %v1006_v28, %v645_v29  ;;  %v599_v29 = vand.u32 127, %v509_v43 }
  0x32   : > { %v647_v31 = vrot.slane %v646_v30, 2 }
  0x34   : > { %v648_v32 = vadd.f32 %v647_v31, %v646_v30  ;;  %v632_v30 = vld [vmem:[#allocation2] sm:$0xf] }
  0x36   : > { %v649_v33 = vrot.slane %v648_v32, 1 }
  0x38   : > { %v650_v34 = vadd.f32 %v649_v33, %v648_v32 }
  0x3a   : > { %1007 = vrcp.f32 %v650_v34 }
  0x44   : > { %v1008_v35 = vpop.eup %1007 }
  0x45   : > { %v652_v36 = vmul.f32 %v1008_v35, %v1006_v28  ;;  %v626_v28 = vld [vmem:[#allocation2] sm:$0xf] }
  0x47   : > { %v653_v37 = vpack.c.bf16 %v652_v36, %v652_v36 }
  0x49   : > { %654 = vst [vmem:[%s491_s16] sm:$0xf] %v653_v37 }
  0x84   : > { %v547_v38 = vpop.permute.xlu0 %546 }
  0x85   : > { %v549_v39 = vsub.f32 %v499_v2, %v547_v38 }
  0x87   : > { %551 = vrot.lane.b32.xlu0 %v549_v39, %s1040_s17  ;;  %s484_s17 = scalar_lea.vmem %s1189_s7, %s1114_s13 }
  0x8b   : > { %526 = vperm.xlu0 %999, %v499_v2   ;;  %v557_v2 = vmul.f32 %v556_v59, %v555_v58 }
  0x8d   : > { %v566_v5 = vrot.slane %v557_v2, %v511_v48 }
  0x8f   : > { %1002 = vset.pattern.permute.xlu0 %v1035_v0 }
  0x91   : > { %v507_v44 = vpop.permute.xlu1 %506 }
  0x92   : > { %v513_v60 = vmin.f32 %v507_v44, %v512_v52 }
  0x96   : > { %v516_v46 = vpop.permute.xlu1 %515 }
  0x97   : > { %v522_v61 = vmax.f32 %v516_v46, %v521_v53 }
  0x99   : > { %v523_v0 = vsub.f32 %v513_v60, %v522_v61 }
  0x9b   : > { %v536_v56 = vpop.permute.xlu1 %535  ;;  %v524_v3 = vmax.f32 %v523_v0, 0.0 }
  0x9c   : > { %v542_v62 = vmax.f32 %v536_v56, %v541_v54 }
  0xf9   : > { %v552_v40 = vpop.permute.xlu0 %551 }
  0xfa   : > { %v554_v41 = vmul.f32 %v552_v40, %v549_v39 }
  0xfc   : > { %560 = vperm.xlu1 %1001, %v554_v41  }
 0x10a   : > { %v527_v57 = vpop.permute.xlu0 %526 }
 0x10b   : > { %v533_v63 = vmin.f32 %v527_v57, %v532_v55 }
 0x10d   : > { %v543_v1 = vsub.f32 %v533_v63, %v542_v62 }
 0x10f   : > { %v544_v4 = vmax.f32 %v543_v1, 0.0 }
 0x111   : > { %v545_v7 = vmul.f32 %v544_v4, %v524_v3 }
 0x17b   : > { %v561_v6 = vpop.permute.xlu1 %560 }
 0x17c   : > { %v567_v8 = vadd.f32 %v566_v5, %v561_v6 }
 0x17e   : > { %v568_v9 = vsub.f32 %v567_v8, %v545_v7 }
 0x180   : > { %v569_v10 = vmax.f32 %v568_v9, 1e-12 }
 0x182   : > { %1009 = vrcp.f32 %v569_v10 }
 0x18c   : > { %v1010_v11 = vpop.eup %1009 }
 0x18d   : > { %v571_v12 = vmul.f32 %v1010_v11, %v545_v7 }
 0x18f   : > { %v573_v13 = vsel %vm572_vm1, %v571_v12, -inf }
 0x190   : > { %596 = vmax.xlane.f32.xlu0 %v573_v13  ;;  %v574_v14 = vrot.slane %v573_v13, 4 }
 0x192   : > { %v575_v15 = vmax.f32 %v573_v13, %v574_v14 }
 0x194   : > { %v576_v16 = vrot.slane %v575_v15, 2 }
 0x196   : > { %v577_v17 = vmax.f32 %v575_v15, %v576_v16 }
 0x198   : > { %v578_v18 = vrot.slane %v577_v17, 1 }
 0x19a   : > { %v579_v19 = vmax.f32 %v577_v17, %v578_v18 }
 0x19c   : > { %vm582_vm2 = vcmp.eq.f32.partialorder %v571_v12, %v579_v19  ;;  %595 = vst [vmem:[%s474_s28] sm:$0x1] %v579_v19 }
 0x19d   : > { %v583_v20 = vsel %vm582_vm2, %v510_v45, 4  ;;  %v628_v45 = vld [vmem:[%s484_s17] sm:$0xf] }
 0x19e   : > { %v584_v21 = vsel %vm572_vm1, %v583_v20, 2147483647 }
 0x19f   : > { %v585_v22 = vrot.slane %v584_v21, 4 }
 0x1a1   : > { %vm586_vm3 = vcmp.lt.s32.totalorder %v584_v21, %v585_v22 }
 0x1a2   : > { %v587_v23 = vsel %vm586_vm3, %v584_v21, %v585_v22 }
 0x1a3   : > { %v588_v24 = vrot.slane %v587_v23, 2 }
 0x1a5   : > { %vm589_vm4 = vcmp.lt.s32.totalorder %v587_v23, %v588_v24 }
 0x1a6   : > { %v590_v25 = vsel %vm589_vm4, %v587_v23, %v588_v24 }
 0x1a7   : > { %v591_v26 = vrot.slane %v590_v25, 1 }
 0x1a9   : > { %vm592_vm5 = vcmp.lt.s32.totalorder %v590_v25, %v591_v26 }
 0x1aa   : > { %v593_v27 = vsel %vm592_vm5, %v590_v25, %v591_v26 }
 0x1ab   : > { %594 = vst [vmem:[%s480_s15] sm:$0x1] %v593_v27 }
 0x21d   : > { %v597_v31 = vpop.xlane.xlu0 %596 }
 0x21e   : > { %vm600_vm6 = vcmp.eq.f32.partialorder %v571_v12, %v597_v31  ;;  %vm627_vm7 = vcmp.gt.f32.partialorder %v597_v31, %v626_v28 }
 0x21f   : > { %v633_v32 = vsel %vm627_vm7, %v597_v31, %v632_v30  ;;  %v601_v33 = vsel %vm600_vm6, %v599_v29, 128 }
 0x220   : > { %634 = vst.msk [vmem:[#allocation2] sm:$0xf] %vm624_vm0, %v633_v32  ;;  %v602_v34 = vsel %vm572_vm1, %v601_v33, 2147483647 }
 0x221   : > { %v604_v35 = vshra.s32 %v602_v34, 16  ;;  %v603_v37 = vand.u32 65535, %v602_v34 }
 0x223   : > { %v606_v36 = vcvt.s32.f32 %v604_v35  ;;  %v605_v39 = vcvt.s32.f32 %v603_v37 }
 0x225   : > { %607 = vmin.xlane.f32.xlu1 %v606_v36 }
 0x2b2   : > { %v608_v38 = vpop.xlane.xlu1 %607 }
 0x2b3   : > { %vm609_vm8 = vcmp.eq.f32.partialorder %v606_v36, %v608_v38  ;;  %v614_v41 = vcvt.f32.s32 %v608_v38 }
 0x2b4   : > { %v610_v40 = vsel %vm609_vm8, %v605_v39, inf }
 0x2b5   : > { %611 = vmin.xlane.f32.xlu0 %v610_v40  ;;  %v615_v43 = vshll.u32 %v614_v41, 16 }
 0x342   : > { %v612_v42 = vpop.xlane.xlu0 %611 }
 0x343   : > { %v613_v44 = vcvt.f32.s32 %v612_v42 }
 0x345   : > { %v616_v46 = vadd.s32 %v615_v43, %v613_v44 }
 0x347   : > { %v629_v47 = vsel %vm627_vm7, %v616_v46, %v628_v45 }
 0x348   : > { %631 = vst.msk [vmem:[%s484_s17] sm:$0xf] %vm624_vm0, %v629_v47 }
 0x349 PF: > { %s20_s11 = sadd.s32 1, %s1033_s11   ;;  %s1192_s30 = smov %s1029_s10 }
 0x34a   : > { %p17_p5 = scmp.ge.s32.totalorder %s20_s11, 4   ;;  %s1193_s10 = smov %s1195_s12 }
 0x34c   :  { %19 = sbr.rel (!%p17_p5) target bundleno = 2 (0x2), region = 134 }

// kernel: _forward_impl.3
= control target key start
LH: loop header
LB: loop body
LE: loop exit
PB: predicated region body
PF: predicated region fallthrough
CT: control target
= control target key end

     0   :  { %s644_s15 = smov 0   ;;  %s646_s16 = smov 0   ;;  %s710_s0 = inlined_call_operand.vmem [shape: f32[2,8,128], index: 0, kind: input, shape index: {}]   ;;  %s711_s1 = inlined_call_operand.vmem [shape: f32[2,4,128], index: 1, kind: input, shape index: {}]   ;;  %s712_s2 = inlined_call_operand.vmem [shape: f32[2,6,128], index: 2, kind: input, shape index: {}]   ;;  %s713_s3 = inlined_call_operand.vmem [shape: f32[4,128], index: 3, kind: input, shape index: {}]   ;;  %s714_s4 = inlined_call_operand.vmem [shape: f32[2,3,128], index: 4, kind: output, shape index: {}]  }
   0x1   :  { %s648_s17 = smov 0  }
   0x2 LB: > { %s26_s18 = sadd.s32 1, %s612_s16  ;;  %p542_p0 = scmp.ge.s32.totalorder %s616_s17, 1  ;;  %s616_s17 = sphi %s648_s17, %s14_s17   ;;  %s612_s16 = sphi %s646_s16, %s716_s16   ;;  %s608_s15 = sphi %s644_s15, %s715_s15  }
   0x3   : > { %p28_p1 = scmp.ge.s32.totalorder %s26_s18, 2  ;;  %p215_p2 = scmp.lt.s32.totalorder %s616_s17, 3 }
   0x5   : > { %s718_s18 = smov (%p28_p1, %s26_s18), 0  ;;  %p216_p3 = pnand %p542_p0, %p215_p2 }
   0x6   : > { %p260_p4 = scmp.lt.s32.totalorder (!%p216_p3), %s608_s15, 1  ;;  %v618_v2 = vmov (!%p216_p3), 0.0   ;;  %v358_v3 = vld [vmem:[%s713_s3] sm:$0xf] (!%p216_p3)  ;;  %v307_v39 = vlaneseq (!%p216_p3) }
   0x7   : > { %219 = sbr.rel (%p216_p3) target bundleno = 134 (0x86), region = 36  ;;  %580 = vrcp.f32 (!%p216_p3), %v358_v3  ;;  %v366_v13 = vmul.f32 (!%p216_p3), 0.1, %v358_v3 }
   0x8   : > { %v308_v43 = vshrl.u32 (!%p216_p3), %v307_v39, 7 }
   0x9   : > { %v368_v17 = vrot.slane (!%p216_p3), %v366_v13, 2 }
   0xa   : > { %vm310_vm1 = vcmp.gt.s32.totalorder (!%p216_p3), %v308_v43, 0 }
   0xe   : > { %s720_s15 = smov (!%p260_p4, %s608_s15), 1 }
   0xf   : > { %s543_s19 = sshll.u32 %s720_s15, 3  ;;  %s544_s23 = sshll.u32 %s720_s15, 2 }
  0x10   : > { %s266_s22 = scalar_lea.vmem %s710_s0, %s543_s19  ;;  %s672_s26 = scalar_lea.vmem %s712_s2, %s543_s19 }
  0x11   : > { %s679_s29 = scalar_lea.vmem %s714_s4, %s544_s23  ;;  %v289_v0 = vld [vmem:[%s266_s22] sm:$0xff]  ;;  %v581_v15 = vpop.eup %580  ;;  %s273_s8 = scalar_lea.vmem %s711_s1, %s544_s23 }
  0x12   : > { %v290_v1 = vrot.slane %v289_v0, 4  ;;  %417 = vst [vmem:[%s679_s29] sm:$0x7] %v618_v2  ;;  %v357_v5 = vld [vmem:[%s672_s26 + $0x2] sm:$0xf]  ;;  %v548_v29 = vld [vmem:[%s672_s26 + $0x1] ss:$0 sm:$0xff] }
  0x13   : > { %v372_v7 = vrot.slane %v357_v5, 6  ;;  %v361_v19 = vrot.slane %v357_v5, 2  ;;  %v359_v30 = vld [vmem:[%s273_s8] sm:$0xf] }
  0x14   : > { %v291_v4 = vmax.f32 %v289_v0, %v290_v1  ;;  %v386_v34 = vmul.f32 %v548_v29, %v359_v30 }
  0x15   : > { %v374_v10 = vsub.f32 %v357_v5, %v372_v7  ;;  %v363_v20 = vadd.f32 %v361_v19, %v357_v5  ;;  %v344_v19 = vsub.s32 0, %v308_v43 }
  0x16   : > { %v292_v6 = vrot.slane %v291_v4, 2 }
  0x17   : > { %v375_v14 = vmax.f32 %v374_v10, 1e-06  ;;  %v364_v22 = vmul.f32 0.5, %v363_v20 }
  0x18   : > { %v293_v8 = vmax.f32 %v291_v4, %v292_v6  ;;  %v340_v6 = vld [vmem:[%s672_s26] sm:$0x1] }
  0x19   : > { %v377_v18 = vmul.f32 %v581_v15, %v375_v14  ;;  %v365_v26 = vsub.f32 %v364_v22, %v358_v3  ;;  %v424_v10 = vld [vmem:[%s679_s29 + $0x2] sm:$0x1]  ;;  %v418_v14 = vld [vmem:[%s679_s29] sm:$0x1]  ;;  %v421_v39 = vld [vmem:[%s679_s29 + $0x1] sm:$0x1] }
  0x1a   : > { %v294_v9 = vrot.slane %v293_v8, 1 }
  0x1c   : > { %v295_v11 = vmax.f32 %v293_v8, %v294_v9 }
  0x1e   : > { %v296_v12 = vsub.f32 %v289_v0, %v295_v11 }
  0x20   : > { %v297_v16 = vmul.f32 1.442695, %v296_v12  ;;  %v553_v12 = vtrunc.f32 %v340_v6 }
  0x22   : > { %582 = vpow2.f32 %v297_v16 }
  0x23   : > { %584 = vrcp.f32 %v368_v17 }
  0x24   : > { %586 = vlog2.f32 %v377_v18  ;;  %v554_v18 = vcvt.f32.s32 %v553_v12 }
  0x2c   : > { %v583_v21 = vpop.eup %582 }
  0x2d   : > { %v299_v23 = vrot.slane %v583_v21, 4  ;;  %v585_v25 = vpop.eup %584 }
  0x2e   : > { %v587_v27 = vpop.eup %586  ;;  %v371_v32 = vmul.f32 %v585_v25, %v365_v26 }
  0x2f   : > { %v300_v24 = vadd.f32 %v583_v21, %v299_v23  ;;  %v379_v33 = vmul.f32 0.6931472, %v587_v27 }
  0x30   : > { %v387_v38 = vsub.f32 %v386_v34, %v371_v32 }
  0x31   : > { %v301_v28 = vrot.slane %v300_v24, 2  ;;  %v381_v37 = vmul.f32 5.0, %v379_v33 }
  0x32   : > { %v388_v40 = vand.u32 2147483647, %v387_v38  ;;  %v390_v41 = vmul.f32 0.5, %v387_v38 }
  0x33   : > { %v302_v31 = vadd.f32 %v301_v28, %v300_v24  ;;  %v398_v42 = vsub.f32 %v386_v34, %v381_v37 }
  0x34   : > { %v391_v44 = vmul.f32 %v390_v41, %v387_v38  ;;  %v549_v45 = vadd.f32 -0.5, %v388_v40  ;;  %vm389_vm0 = vcmp.lt.f32.partialorder %v388_v40, 1.0 }
  0x35   : > { %v303_v35 = vrot.slane %v302_v31, 1  ;;  %v399_v46 = vand.u32 2147483647, %v398_v42  ;;  %v401_v47 = vmul.f32 0.5, %v398_v42 }
  0x36   : > { %v393_v50 = vsel %vm389_vm0, %v391_v44, %v549_v45 }
  0x37   : > { %v304_v36 = vadd.f32 %v303_v35, %v302_v31  ;;  %v402_v51 = vmul.f32 %v401_v47, %v398_v42  ;;  %v550_v52 = vadd.f32 -0.5, %v399_v46  ;;  %vm400_vm2 = vcmp.lt.f32.partialorder %v399_v46, 1.0 }
  0x38   : > { %v395_v53 = vrot.slane %v393_v50, 1 }
  0x39   : > { %588 = vrcp.f32 %v304_v36  ;;  %v404_v55 = vsel %vm400_vm2, %v402_v51, %v550_v52 }
  0x3a   : > { %v397_v59 = vadd.f32 %v395_v53, %v393_v50  ;;  %v406_v60 = vrot.slane %v404_v55, 2  ;;  %v409_v3 = vrot.slane %v404_v55, 3 }
  0x3c   : > { %v408_v1 = vadd.f32 %v406_v60, %v397_v59 }
  0x3e   : > { %v411_v9 = vadd.f32 %v409_v3, %v408_v1 }
  0x43   : > { %v589_v48 = vpop.eup %588 }
  0x44   : > { %v306_v49 = vmul.f32 %v589_v48, %v583_v21  ;;  %v345_v21 = vrot.slane %v554_v18, %v344_v19 }
  0x46   : > { %vm309_vm3 = vcmp.gt.f32.partialorder %v306_v49, 0.1  ;;  %vm346_vm6 = vcmp.eq.s32.totalorder %v308_v43, %v345_v21 }
  0x47   : > { %vm311_vm4 = vmand %vm309_vm3, %vm310_vm1 }
  0x48   : > { %v312_v54 = vsel %vm311_vm4, %v306_v49, 0.0 }
  0x49   : > { %v313_v56 = vrot.slane %v312_v54, 4  ;;  %v347_v24 = vsel %vm346_vm6, %v312_v54, 0.0 }
  0x4a   : > { %v348_v26 = vrot.slane %v347_v24, 4 }
  0x4b   : > { %v314_v57 = vadd.f32 %v313_v56, %v312_v54  ;;  %v323_v58 = vmax.f32 %v312_v54, %v313_v56 }
  0x4c   : > { %v349_v28 = vadd.f32 %v348_v26, %v347_v24 }
  0x4d   : > { %v315_v61 = vrot.slane %v314_v57, 2  ;;  %v324_v62 = vrot.slane %v323_v58, 2 }
  0x4e   : > { %v350_v31 = vrot.slane %v349_v28, 2 }
  0x4f   : > { %v316_v63 = vadd.f32 %v315_v61, %v314_v57  ;;  %v325_v0 = vmax.f32 %v323_v58, %v324_v62 }
  0x50   : > { %v351_v32 = vadd.f32 %v350_v31, %v349_v28 }
  0x51   : > { %v317_v4 = vrot.slane %v316_v63, 1  ;;  %v326_v5 = vrot.slane %v325_v0, 1 }
  0x52   : > { %v352_v33 = vrot.slane %v351_v32, 1 }
  0x53   : > { %v318_v7 = vadd.f32 %v317_v4, %v316_v63  ;;  %v327_v8 = vmax.f32 %v325_v0, %v326_v5 }
  0x54   : > { %v353_v36 = vadd.f32 %v352_v33, %v351_v32 }
  0x55   : > { %vm319_vm5 = vcmp.ne.f32.partialorder %v318_v7, 0.0  ;;  %v328_v11 = vsub.f32 %v312_v54, %v327_v8 }
  0x56   : > { %v547_v13 = vsel %vm319_vm5, 1.0, %v618_v2 }
  0x57   : > { %v329_v15 = vmul.f32 1.442695, %v328_v11  ;;  %v412_v16 = vmul.f32 %v547_v13, %v411_v9  ;;  %v425_v17 = vadd.f32 %v547_v13, %v424_v10 }
  0x59   : > { %590 = vpow2.f32 %v329_v15  ;;  %v419_v20 = vadd.f32 %v418_v14, %v412_v16  ;;  %426 = vst [vmem:[%s679_s29 + $0x2] sm:$0x1] %v425_v17 }
  0x5b   : > { %420 = vst [vmem:[%s679_s29] sm:$0x1] %v419_v20 }
  0x63   : > { %v591_v22 = vpop.eup %590 }
  0x64   : > { %v331_v23 = vrot.slane %v591_v22, 4 }
  0x66   : > { %v332_v25 = vadd.f32 %v591_v22, %v331_v23 }
  0x68   : > { %v333_v27 = vrot.slane %v332_v25, 2 }
  0x6a   : > { %v334_v2 = vadd.f32 %v333_v27, %v332_v25 }
  0x6c   : > { %v335_v29 = vrot.slane %v334_v2, 1 }
  0x6e   : > { %v336_v30 = vadd.f32 %v335_v29, %v334_v2 }
  0x70   : > { %592 = vlog2.f32 %v336_v30 }
  0x7a   : > { %v593_v34 = vpop.eup %592 }
  0x7b   : > { %v338_v35 = vmul.f32 0.6931472, %v593_v34 }
  0x7d   : > { %v339_v37 = vadd.f32 %v338_v35, %v327_v8 }
  0x7f   : > { %v354_v38 = vsub.f32 %v339_v37, %v353_v36 }
  0x81   : > { %v355_v40 = vmul.f32 %v547_v13, %v354_v38 }
  0x83   : > { %v422_v41 = vadd.f32 %v421_v39, %v355_v40 }
  0x85   : > { %423 = vst [vmem:[%s679_s29 + $0x1] sm:$0x1] %v422_v41 }
  0x86 PF: > { %s14_s17 = sadd.s32 1, %s616_s17   ;;  %s715_s15 = smov %s612_s16 }
  0x87   : > { %p11_p5 = scmp.ge.s32.totalorder %s14_s17, 4   ;;  %s716_s16 = smov %s718_s18 }
  0x89   :  { %13 = sbr.rel (!%p11_p5) target bundleno = 2 (0x2), region = 79 }

</bundles_post_ra>
